<compile_context>
chip_gen: v7x
topology: tpu7x:2x2x1
jax: 0.10.0
libtpu: 0.0.40
codegen_flags: <defaults>
</compile_context>

<pallas_src>
import numpy as np
import jax
import jax.numpy as jnp
from jax.experimental import pallas as pl
from jax.experimental.pallas import tpu as pltpu


def _round_up(n: int, m: int) -> int:
    return ((n + m - 1) // m) * m


def qnet_kernel(x_ref, w1_ref, b1_ref, w2_ref, b2_ref, o_ref):
    """Fused forward for one folded batch tile: relu(x @ W1 + b1) @ W2 + b2."""
    # Layer 1 on the MXU (bf16 x bf16 -> f32 accumulation).
    h = jnp.dot(x_ref[...], w1_ref[...], preferred_element_type=jnp.float32)
    h = jnp.maximum(h + b1_ref[...], 0.0)          # bias (f32) + ReLU in f32
    # Layer 2: feed the MXU in the weight dtype (bf16 path -> far fewer vmatmul
    # passes than an f32 pass); accumulate in f32.
    y = jnp.dot(h.astype(w2_ref.dtype), w2_ref[...],
                preferred_element_type=jnp.float32)
    o_ref[...] = (y + b2_ref[...]).astype(o_ref.dtype)


def linear_qnet_forward(x, w1, b1, w2, b2, *, fold=32, tile_rows=8192,
                        out_dtype=jnp.float32):
    """Batched forward with lane-dense batch folding.

    fold (F): number of logical batch rows packed into one lane-dense row.
              F=32 makes the output exactly 128-lane for out_size=4.
    tile_rows: logical batch rows per grid step (>= 4096 recommended).
    """
    B, in_size = x.shape
    hid = w1.shape[1]
    out_size = w2.shape[1]

    F = max(1, int(fold))
    Bp = _round_up(B, F)
    if Bp != B:                                   # pad so B is a multiple of F
        x = jnp.pad(x, ((0, Bp - B), (0, 0)))
    G = Bp // F                                   # folded rows

    # Free, contiguous reshape (no transpose): (Bp, in) -> (G, F*in).
    x_fold = x.reshape(G, F * in_size)

    # One-time weight prep (cache across calls in production): block-diagonal
    # replication so F logical rows ride in one lane-dense folded row.
    w1_blk = jnp.kron(jnp.eye(F, dtype=w1.dtype), w1)            # (F*in,  F*hid)
    w2_blk = jnp.kron(jnp.eye(F, dtype=w2.dtype), w2)            # (F*hid, F*out)
    b1_fold = jnp.tile(b1.astype(jnp.float32).reshape(1, hid), (1, F))
    b2_fold = jnp.tile(b2.astype(jnp.float32).reshape(1, out_size), (1, F))

    # Batch tile in folded rows (tile_g folded rows == tile_g * F logical rows).
    tile_g = min(max(1, tile_rows // F), G)
    if tile_g != G:
        tile_g = _round_up(tile_g, 8)             # sublane-aligned when not full-dim
    grid = (pl.cdiv(G, tile_g),)

    in_specs = [
        pl.BlockSpec((tile_g, F * in_size), lambda i: (i, 0)),     # x: tiled over batch
        pl.BlockSpec((F * in_size, F * hid), lambda i: (0, 0)),    # W1: resident
        pl.BlockSpec((1, F * hid), lambda i: (0, 0)),              # b1: resident (f32)
        pl.BlockSpec((F * hid, F * out_size), lambda i: (0, 0)),   # W2: resident
        pl.BlockSpec((1, F * out_size), lambda i: (0, 0)),         # b2: resident (f32)
    ]
    out_specs = pl.BlockSpec((tile_g, F * out_size), lambda i: (i, 0))

    itemsize = lambda a: np.dtype(a.dtype).itemsize
    bytes_accessed = int(
        x_fold.size * itemsize(x_fold)
        + w1_blk.size * itemsize(w1_blk) + b1_fold.size * 4
        + w2_blk.size * itemsize(w2_blk) + b2_fold.size * 4
        + Bp * out_size * np.dtype(out_dtype).itemsize
    )
    cost = pl.CostEstimate(
        # MXU work actually issued (includes block-diagonal zero blocks).
        flops=2 * Bp * F * (in_size * hid + hid * out_size),
        transcendentals=0,
        bytes_accessed=bytes_accessed,
    )

    y_fold = pl.pallas_call(
        qnet_kernel,
        out_shape=jax.ShapeDtypeStruct((G, F * out_size), out_dtype),
        grid_spec=pltpu.PrefetchScalarGridSpec(
            num_scalar_prefetch=0,
            grid=grid,
            in_specs=in_specs,
            out_specs=out_specs,
        ),
        compiler_params=pltpu.CompilerParams(
            dimension_semantics=("parallel",),
        ),
        cost_estimate=cost,
    )(x_fold, w1_blk, b1_fold, w2_blk, b2_fold)

    # Free reshape back to logical layout and drop the padding rows.
    return y_fold.reshape(Bp, out_size)[:B]


def init_params(key, input_size, hidden_size, output_size, dtype=jnp.float32):
    """Deterministic init mimicking nn.Linear's U(-1/sqrt(fan_in), 1/sqrt(fan_in))."""
    k1, k2, k3, k4 = jax.random.split(key, 4)
    bound1 = 1.0 / (input_size ** 0.5)
    bound2 = 1.0 / (hidden_size ** 0.5)
    # Stored as (in, out) -- transpose of PyTorch's (out, in).
    w1 = jax.random.uniform(k1, (input_size, hidden_size), dtype, -bound1, bound1)
    b1 = jax.random.uniform(k2, (1, hidden_size), dtype, -bound1, bound1)
    w2 = jax.random.uniform(k3, (hidden_size, output_size), dtype, -bound2, bound2)
    b2 = jax.random.uniform(k4, (1, output_size), dtype, -bound2, bound2)
    return w1, b1, w2, b2

# TODO(synk): save()/load() checkpoint I/O from the PyTorch module is host-side
# file handling, not kernel work -- omitted.


if __name__ == "__main__":
    # Small shapes consistent with the module's forward: (B, input_size) -> (B, output_size).
    batch, input_size, hidden_size, output_size = 48, 16, 32, 4

    key = jax.random.PRNGKey(0)
    k_x, k_p = jax.random.split(key)
    x32 = jax.random.normal(k_x, (batch, input_size), dtype=jnp.float32)
    w1_32, b1_32, w2_32, b2_32 = init_params(k_p, input_size, hidden_size, output_size)

    # bf16 memory path for activations + weights; biases stay f32 (resident, tiny).
    x = x32.astype(jnp.bfloat16)
    w1 = w1_32.astype(jnp.bfloat16)
    w2 = w2_32.astype(jnp.bfloat16)
    b1, b2 = b1_32, b2_32

    # Reference: full-f32 math on the same (bf16-quantized) operands.
    xf = x.astype(jnp.float32)
    w1f = w1.astype(jnp.float32)
    w2f = w2.astype(jnp.float32)
    hi = jax.lax.Precision.HIGHEST
    h_ref = jnp.maximum(jnp.dot(xf, w1f, precision=hi) + b1, 0.0)
    ref = jnp.dot(h_ref, w2f, precision=hi) + b2

    # 1) Production config: F=32 fold (x 512-lane, output exactly 128-lane),
    #    large tiles -> a single grid step at this batch size.
    out = linear_qnet_forward(x, w1, b1, w2, b2, fold=32, tile_rows=8192,
                              out_dtype=jnp.float32)
    out = jax.block_until_ready(out)
    assert out.shape == (batch, output_size)
    assert out.dtype == jnp.float32
    # 2e-3 tolerance covers the bf16 rounding of h feeding the layer-2 MXU pass.
    assert jnp.allclose(out, ref, atol=2e-3, rtol=2e-3), \
        float(jnp.max(jnp.abs(out - ref)))

    # 2) Tiny fold + tiny tile purely to exercise a multi-step, ragged pipelined grid.
    out2 = linear_qnet_forward(x, w1, b1, w2, b2, fold=4, tile_rows=16,
                               out_dtype=jnp.float32)
    out2 = jax.block_until_ready(out2)
    assert out2.shape == (batch, output_size)
    assert jnp.allclose(out2, ref, atol=2e-3, rtol=2e-3), \
        float(jnp.max(jnp.abs(out2 - ref)))

    print("KERNEL_OK")
</pallas_src>

<mosaic_0001>
module attributes {stable_mosaic.version = 11 : i64} {
  func.func @qnet_kernel(%arg0: i32, %arg1: memref<2x512xbf16, #tpu.memory_space<vmem>>, %arg2: memref<512x1024xbf16, #tpu.memory_space<vmem>>, %arg3: memref<1x1024xf32, #tpu.memory_space<vmem>>, %arg4: memref<1024x128xbf16, #tpu.memory_space<vmem>>, %arg5: memref<1x128xf32, #tpu.memory_space<vmem>>, %arg6: memref<2x128xf32, #tpu.memory_space<vmem>>) attributes {dimension_semantics = [#tpu.dimension_semantics<parallel>], iteration_bounds = array<i64: 1>, scalar_prefetch = 0 : i64, scratch_operands = 0 : i64, tpu.core_type = #tpu.core_type<tc>, window_params = [{transform_indices = @transform_0, window_bounds = array<i64: 2, 512>}, {pipeline_mode = #tpu.pipeline_mode<synchronous>, transform_indices = @transform_1, window_bounds = array<i64: 512, 1024>}, {pipeline_mode = #tpu.pipeline_mode<synchronous>, transform_indices = @transform_2, window_bounds = array<i64: 1, 1024>}, {pipeline_mode = #tpu.pipeline_mode<synchronous>, transform_indices = @transform_3, window_bounds = array<i64: 1024, 128>}, {pipeline_mode = #tpu.pipeline_mode<synchronous>, transform_indices = @transform_4, window_bounds = array<i64: 1, 128>}, {transform_indices = @transform_5, window_bounds = array<i64: 2, 128>}]} {
    %c0 = arith.constant 0 : index
    %c0_0 = arith.constant 0 : index
    %0 = vector.load %arg1[%c0, %c0_0] : memref<2x512xbf16, #tpu.memory_space<vmem>>, vector<2x512xbf16>
    %c0_1 = arith.constant 0 : index
    %c0_2 = arith.constant 0 : index
    %1 = vector.load %arg2[%c0_1, %c0_2] : memref<512x1024xbf16, #tpu.memory_space<vmem>>, vector<512x1024xbf16>
    %cst = arith.constant dense<0.000000e+00> : vector<2x1024xf32>
    %2 = tpu.matmul %0, %1, %cst {dimension_numbers = #tpu.dot_dimension_numbers<[1], [0], [0], [1], [0, 0, 1, 1], [], []>} : vector<2x512xbf16>, vector<512x1024xbf16>, vector<2x1024xf32> -> vector<2x1024xf32>
    %c0_3 = arith.constant 0 : index
    %c0_4 = arith.constant 0 : index
    %3 = vector.load %arg3[%c0_3, %c0_4] : memref<1x1024xf32, #tpu.memory_space<vmem>>, vector<1x1024xf32>
    %4 = vector.broadcast %3 : vector<1x1024xf32> to vector<2x1024xf32>
    %5 = arith.addf %2, %4 : vector<2x1024xf32>
    %cst_5 = arith.constant 0.000000e+00 : f32
    %6 = vector.broadcast %cst_5 : f32 to vector<2x1024xf32>
    %7 = arith.maximumf %5, %6 : vector<2x1024xf32>
    %8 = arith.truncf %7 : vector<2x1024xf32> to vector<2x1024xbf16>
    %c0_6 = arith.constant 0 : index
    %c0_7 = arith.constant 0 : index
    %9 = vector.load %arg4[%c0_6, %c0_7] : memref<1024x128xbf16, #tpu.memory_space<vmem>>, vector<1024x128xbf16>
    %cst_8 = arith.constant dense<0.000000e+00> : vector<2x128xf32>
    %10 = tpu.matmul %8, %9, %cst_8 {dimension_numbers = #tpu.dot_dimension_numbers<[1], [0], [0], [1], [0, 0, 1, 1], [], []>} : vector<2x1024xbf16>, vector<1024x128xbf16>, vector<2x128xf32> -> vector<2x128xf32>
    %c0_9 = arith.constant 0 : index
    %c0_10 = arith.constant 0 : index
    %11 = vector.load %arg5[%c0_9, %c0_10] : memref<1x128xf32, #tpu.memory_space<vmem>>, vector<1x128xf32>
    %12 = vector.broadcast %11 : vector<1x128xf32> to vector<2x128xf32>
    %13 = arith.addf %10, %12 : vector<2x128xf32>
    %c0_11 = arith.constant 0 : index
    %c0_12 = arith.constant 0 : index
    %14 = vector.load %arg6[%c0_11, %c0_12] : memref<2x128xf32, #tpu.memory_space<vmem>>, vector<2x128xf32>
    tpu.vector_store %arg6[%c0_11, %c0_12], %13 {strides = array<i32>} : memref<2x128xf32, #tpu.memory_space<vmem>>, vector<2x128xf32>,
    return
  }
  func.func @transform_0(%arg0: i32) -> (i32, i32) {
    %c0_i32 = arith.constant 0 : i32
    %c0_i32_0 = arith.constant 0 : i32
    return %arg0, %c0_i32 : i32, i32
  }
  func.func @transform_1(%arg0: i32) -> (i32, i32) {
    %c0_i32 = arith.constant 0 : i32
    %c0_i32_0 = arith.constant 0 : i32
    %c0_i32_1 = arith.constant 0 : i32
    return %c0_i32, %c0_i32_0 : i32, i32
  }
  func.func @transform_2(%arg0: i32) -> (i32, i32) {
    %c0_i32 = arith.constant 0 : i32
    %c0_i32_0 = arith.constant 0 : i32
    %c0_i32_1 = arith.constant 0 : i32
    return %c0_i32, %c0_i32_0 : i32, i32
  }
  func.func @transform_3(%arg0: i32) -> (i32, i32) {
    %c0_i32 = arith.constant 0 : i32
    %c0_i32_0 = arith.constant 0 : i32
    %c0_i32_1 = arith.constant 0 : i32
    return %c0_i32, %c0_i32_0 : i32, i32
  }
  func.func @transform_4(%arg0: i32) -> (i32, i32) {
    %c0_i32 = arith.constant 0 : i32
    %c0_i32_0 = arith.constant 0 : i32
    %c0_i32_1 = arith.constant 0 : i32
    return %c0_i32, %c0_i32_0 : i32, i32
  }
  func.func @transform_5(%arg0: i32) -> (i32, i32) {
    %c0_i32 = arith.constant 0 : i32
    %c0_i32_0 = arith.constant 0 : i32
    return %arg0, %c0_i32 : i32, i32
  }
}

</mosaic_0001>

<bundles_post_ra>
// kernel: tpu_custom_call.1
= control target key start
LH: loop header
LB: loop body
LE: loop exit
PB: predicated region body
PF: predicated region fallthrough
CT: control target
= control target key end

     0   :  { %10 = vsyncpa [#allocation3], 0  ;;  %s3509_s0 = inlined_call_operand.hbm [shape: bf16[2,512], index: 0, kind: input, shape index: {}]   ;;  %s3510_s1 = inlined_call_operand.hbm [shape: bf16[512,1024], index: 1, kind: input, shape index: {}]   ;;  %s3511_s2 = inlined_call_operand.hbm [shape: f32[1,1024], index: 2, kind: input, shape index: {}]   ;;  %s3512_s3 = inlined_call_operand.hbm [shape: bf16[1024,128], index: 3, kind: input, shape index: {}]   ;;  %s3513_s4 = inlined_call_operand.vmem [shape: f32[1,128], index: 4, kind: input, shape index: {}]   ;;  %s3514_s5 = inlined_call_operand.hbm [shape: f32[2,128], index: 5, kind: output, shape index: {}]  }
   0x1   :  { %11 = vsyncpa [#allocation6], 0 }
   0x2   :  { %12 = vsyncpa [#allocation9], 0 }
   0x3   :  { %13 = vsyncpa [#allocation4], 0  ;;  %s3348_s18 = smov [#allocation5]   ;;  %s3230_s22 = scalar_lea.hbm %s3510_s1, 32768 }
   0x4   :  { %s29_s19 = sshll.u32 %s3348_s18, 4  ;;  %p3231_p0 = scmp.ne.s32.totalorder %s3510_s1, %s3230_s22  ;;  %s30_s19 = int_to_ptr.vmem [resolvable:$true] %s29_s19 }
   0x5   :  { %p3234_p1 = scmp.lt.u32.totalorder %s3230_s22, %s3510_s1 }
   0x7   :  { %p3236_p2 = pnand %p3234_p1, %p3231_p0 }
   0x9   :  { %3239 = shalt.err (!%p3236_p2)
}
   0xa   :  { %s3240_s27 = scalar_lea.vmem %s30_s19, 32768  ;;  %p3245_p4 = scmp.lt.s32.totalorder %s30_s19, %s30_s19 }
   0xb   :  { %p3241_p3 = scmp.ne.s32.totalorder %s30_s19, %s3240_s27  ;;  %p3246_p5 = scmp.lt.s32.totalorder %s3240_s27, %s3240_s27 }
   0xd   :  { %p3247_p6 = por %p3246_p5, %p3245_p4 }
   0xf   :  { %p3248_p7 = pnand %p3247_p6, %p3241_p3 }
  0x11   :  { %3251 = shalt.err (!%p3248_p7)
}
  0x12   :  { %s3349_s28 = smov 512   ;;  %s3350_s29 = smov 32  }
  0x13   :  { %35 = dma.hbm_to_vmem [thread:$0]  %s3510_s1, 32768, %s30_s19, [#allocation6], %s3349_s28, %s3349_s28, %s3350_s29  }
  0x14   :  { %s3351_s7 = smov [#allocation2]   ;;  %s3352_s9 = smov [#allocation7]  }
  0x15   :  { %s20_s8 = sshll.u32 %s3351_s7, 4  ;;  %s42_s10 = sshll.u32 %s3352_s9, 4  ;;  %s21_s8 = int_to_ptr.vmem [resolvable:$true] %s20_s8  ;;  %s43_s10 = int_to_ptr.vmem [resolvable:$true] %s42_s10 }
  0x16   :  { %s3252_s13 = scalar_lea.hbm %s3509_s0, 64 }
  0x17   :  { %p3253_p8 = scmp.ne.s32.totalorder %s3509_s0, %s3252_s13  ;;  %p3256_p9 = scmp.lt.u32.totalorder %s3252_s13, %s3509_s0 }
  0x19   :  { %p3258_p10 = pnand %p3256_p9, %p3253_p8 }
  0x1b   :  { %3261 = shalt.err (!%p3258_p10)
}
  0x1c   :  { %s3262_s1 = scalar_lea.vmem %s21_s8, 64  ;;  %p3267_p12 = scmp.lt.s32.totalorder %s21_s8, %s21_s8 }
  0x1d   :  { %p3263_p11 = scmp.ne.s32.totalorder %s21_s8, %s3262_s1  ;;  %p3268_p13 = scmp.lt.s32.totalorder %s3262_s1, %s3262_s1 }
  0x1f   :  { %p3269_p0 = por %p3268_p13, %p3267_p12 }
  0x21   :  { %p3270_p1 = pnand %p3269_p0, %p3263_p11 }
  0x23   :  { %3273 = shalt.err (!%p3270_p1)
}
  0x24   :  { %23 = dma.hbm_to_vmem [thread:$0]  %s3509_s0, 64, %s21_s8, [#allocation3]  }
  0x25   :  { %s3274_s22 = scalar_lea.hbm %s3511_s2, 128 }
  0x26   :  { %p3275_p2 = scmp.ne.s32.totalorder %s3511_s2, %s3274_s22  ;;  %p3278_p3 = scmp.lt.u32.totalorder %s3274_s22, %s3511_s2 }
  0x28   :  { %p3280_p4 = pnand %p3278_p3, %p3275_p2 }
  0x2a   :  { %3283 = shalt.err (!%p3280_p4)
}
  0x2b   :  { %s3284_s27 = scalar_lea.vmem %s43_s10, 128  ;;  %p3289_p6 = scmp.lt.s32.totalorder %s43_s10, %s43_s10 }
  0x2c   :  { %p3285_p5 = scmp.ne.s32.totalorder %s43_s10, %s3284_s27  ;;  %p3290_p7 = scmp.lt.s32.totalorder %s3284_s27, %s3284_s27 }
  0x2e   :  { %p3291_p8 = por %p3290_p7, %p3289_p6 }
  0x30   :  { %p3292_p9 = pnand %p3291_p8, %p3285_p5 }
  0x32   :  { %3295 = shalt.err (!%p3292_p9)
}
  0x33   :  { %45 = dma.hbm_to_vmem [thread:$0]  %s3511_s2, 128, %s43_s10, [#allocation6]  }
  0x34   :  { %s3353_s29 = smov [#allocation8]   ;;  %s3296_s8 = scalar_lea.hbm %s3512_s3, 8192 }
  0x35   :  { %s51_s30 = sshll.u32 %s3353_s29, 4  ;;  %p3297_p10 = scmp.ne.s32.totalorder %s3512_s3, %s3296_s8  ;;  %s52_s30 = int_to_ptr.vmem [resolvable:$true] %s51_s30 }
  0x36   :  { %p3300_p11 = scmp.lt.u32.totalorder %s3296_s8, %s3512_s3 }
  0x38   :  { %p3302_p12 = pnand %p3300_p11, %p3297_p10 }
  0x3a   :  { %3305 = shalt.err (!%p3302_p12)
}
  0x3b   :  { %s3306_s14 = scalar_lea.vmem %s52_s30, 8192  ;;  %p3311_p0 = scmp.lt.s32.totalorder %s52_s30, %s52_s30 }
  0x3c   :  { %p3307_p13 = scmp.ne.s32.totalorder %s52_s30, %s3306_s14  ;;  %p3312_p1 = scmp.lt.s32.totalorder %s3306_s14, %s3306_s14 }
  0x3e   :  { %p3313_p2 = por %p3312_p1, %p3311_p0 }
  0x40   :  { %p3314_p3 = pnand %p3313_p2, %p3307_p13 }
  0x42   :  { %3317 = shalt.err (!%p3314_p3)
}
  0x43   :  { %s3354_s2 = smov 64   ;;  %s3355_s10 = smov 4  }
  0x44   :  { %57 = dma.hbm_to_vmem [thread:$0]  %s3512_s3, 8192, %s52_s30, [#allocation9], %s3354_s2, %s3354_s2, %s3355_s10  }
  0x45   :  { %3340 = dma.done.wait [#allocation3], 64  }
  0x46   :  { %3341 = vsyncadd [#allocation3], 4294967232 }
  0x47   :  { %3342 = dma.done.wait [#allocation6], 32896  }
  0x48   :  { %3343 = vsyncadd [#allocation6], 4294934400 }
  0x49   :  { %3344 = dma.done.wait [#allocation9], 8192  }
  0x4a   :  { %3345 = vsyncadd [#allocation9], 4294959104  ;;  %v74_v0 = vld [vmem:[#allocation5] sm:$0xff]  ;;  %v75_v2 = vld [vmem:[#allocation5 + $0x8] sm:$0xff]  ;;  %v332_v35 = vlaneseq  ;;  %v3356_v36 = vmov 1966171168  }
  0x4b   :  { %v78_v1 = vld [vmem:[#allocation5 + $0x20] sm:$0xff]  ;;  %v79_v4 = vld [vmem:[#allocation5 + $0x28] sm:$0xff]  ;;  %v382_v37 = vunpack.c.l.s4 %v3356_v36  ;;  %v3441_v59 = vld.sshfl [vmem:[#allocation2] sm:$0x33 pattern:$0x75316420] }
  0x4c   :  { %v2724_v3 = vcombine.high %v74_v0, %v78_v1  ;;  %v2723_v5 = vcombine.low %v74_v0, %v78_v1  ;;  %v82_v6 = vld [vmem:[#allocation5 + $0x40] sm:$0xff]  ;;  %v2726_v8 = vcombine.high %v75_v2, %v79_v4  ;;  %v2725_v9 = vcombine.low %v75_v2, %v79_v4  ;;  %v83_v11 = vld [vmem:[#allocation5 + $0x48] sm:$0xff] }
  0x4d   :  { %v86_v7 = vld [vmem:[#allocation5 + $0x60] sm:$0xff]  ;;  %v87_v12 = vld [vmem:[#allocation5 + $0x68] sm:$0xff]  ;;  %v3436_v46 = vshrl.u32 %v332_v35, 7  ;;  %v383_v47 = vunpack.c.0.s8 %v382_v37  ;;  %v380_v63 = vcombine.high %v3441_v59, %v3441_v59 }
  0x4e   :  { %v2732_v10 = vcombine.high %v82_v6, %v86_v7  ;;  %v90_v13 = vld [vmem:[#allocation5 + $0x80] sm:$0xff]  ;;  %1681 = vmatprep.subr.bf16.mxu0 %v2724_v3  ;;  %v2734_v14 = vcombine.high %v83_v11, %v87_v12  ;;  %v91_v16 = vld [vmem:[#allocation5 + $0x88] sm:$0xff]  ;;  %1763 = vmatprep.subr.bf16.mxu1 %v2726_v8  ;;  %v2731_v18 = vcombine.low %v82_v6, %v86_v7 }
  0x4f   :  { %v94_v15 = vld [vmem:[#allocation5 + $0xa0] sm:$0xff]  ;;  %v95_v17 = vld [vmem:[#allocation5 + $0xa8] sm:$0xff]  ;;  %1682 = vmatpush1.bf16.msra.mxu0 %v2723_v5  ;;  %1764 = vmatpush1.bf16.msra.mxu1 %v2725_v9  ;;  %v2733_v19 = vcombine.low %v83_v11, %v87_v12  ;;  %v3439_v56 = vsub.s32 %v383_v47, %v3436_v46 }
  0x50   :  { %1683 = vmatprep.subr.bf16.mxu0 %v2732_v10  ;;  %v2740_v20 = vcombine.high %v90_v13, %v94_v15  ;;  %1765 = vmatprep.subr.bf16.mxu1 %v2734_v14  ;;  %v2742_v21 = vcombine.high %v91_v16, %v95_v17  ;;  %v98_v22 = vld [vmem:[#allocation5 + $0xc0] sm:$0xff]  ;;  %v99_v24 = vld [vmem:[#allocation5 + $0xc8] sm:$0xff]  ;;  %v2739_v26 = vcombine.low %v90_v13, %v94_v15 }
  0x51   :  { %v102_v23 = vld [vmem:[#allocation5 + $0xe0] sm:$0xff]  ;;  %v103_v25 = vld [vmem:[#allocation5 + $0xe8] sm:$0xff]  ;;  %v2741_v27 = vcombine.low %v91_v16, %v95_v17  ;;  %v3446_v3 = vrot.slane %v380_v63, %v3439_v56 }
  0x52   :  { %v2748_v28 = vcombine.high %v98_v22, %v102_v23  ;;  %v2750_v29 = vcombine.high %v99_v24, %v103_v25  ;;  %v106_v30 = vld [vmem:[#allocation5 + $0x100] sm:$0xff]  ;;  %v107_v32 = vld [vmem:[#allocation5 + $0x108] sm:$0xff]  ;;  %v2747_v34 = vcombine.low %v98_v22, %v102_v23  ;;  %v2749_v38 = vcombine.low %v99_v24, %v103_v25 }
  0x53   :  { %1684 = vmatpush1.bf16.msra.mxu0 %v2731_v18  ;;  %1766 = vmatpush1.bf16.msra.mxu1 %v2733_v19  ;;  %v110_v31 = vld [vmem:[#allocation5 + $0x120] sm:$0xff]  ;;  %v111_v33 = vld [vmem:[#allocation5 + $0x128] sm:$0xff] }
  0x54   :  { %1685 = vmatprep.subr.bf16.mxu0 %v2740_v20  ;;  %1767 = vmatprep.subr.bf16.mxu1 %v2742_v21  ;;  %v2756_v39 = vcombine.high %v106_v30, %v110_v31  ;;  %v2758_v40 = vcombine.high %v107_v32, %v111_v33  ;;  %v114_v41 = vld [vmem:[#allocation5 + $0x140] sm:$0xff]  ;;  %v115_v43 = vld [vmem:[#allocation5 + $0x148] sm:$0xff]  ;;  %v2755_v45 = vcombine.low %v106_v30, %v110_v31 }
  0x55   :  { %v118_v42 = vld [vmem:[#allocation5 + $0x160] sm:$0xff]  ;;  %v119_v44 = vld [vmem:[#allocation5 + $0x168] sm:$0xff]  ;;  %v2757_v48 = vcombine.low %v107_v32, %v111_v33  ;;  %1713 = vmatprep.mubr.bf16.mxu0 %v3446_v3  ;;  %1795 = vmatprep.mubr.bf16.mxu1 %v3446_v3 }
  0x56   :  { %v2764_v49 = vcombine.high %v114_v41, %v118_v42  ;;  %v2766_v50 = vcombine.high %v115_v43, %v119_v44  ;;  %v122_v51 = vld [vmem:[#allocation5 + $0x180] sm:$0xff]  ;;  %v123_v53 = vld [vmem:[#allocation5 + $0x188] sm:$0xff]  ;;  %v2763_v55 = vcombine.low %v114_v41, %v118_v42  ;;  %v2765_v57 = vcombine.low %v115_v43, %v119_v44 }
  0x57   :  { %1686 = vmatpush1.bf16.msra.mxu0 %v2739_v26  ;;  %1768 = vmatpush1.bf16.msra.mxu1 %v2741_v27  ;;  %v126_v52 = vld [vmem:[#allocation5 + $0x1a0] sm:$0xff]  ;;  %v127_v54 = vld [vmem:[#allocation5 + $0x1a8] sm:$0xff] }
  0x58   :  { %1687 = vmatprep.subr.bf16.mxu0 %v2748_v28  ;;  %1769 = vmatprep.subr.bf16.mxu1 %v2750_v29  ;;  %v2772_v58 = vcombine.high %v122_v51, %v126_v52  ;;  %v2774_v60 = vcombine.high %v123_v53, %v127_v54  ;;  %v130_v61 = vld [vmem:[#allocation5 + $0x1c0] sm:$0xff]  ;;  %v131_v0 = vld [vmem:[#allocation5 + $0x1c8] sm:$0xff]  ;;  %v2771_v2 = vcombine.low %v122_v51, %v126_v52 }
  0x59   :  { %v134_v62 = vld [vmem:[#allocation5 + $0x1e0] sm:$0xff]  ;;  %v135_v1 = vld [vmem:[#allocation5 + $0x1e8] sm:$0xff]  ;;  %v2773_v4 = vcombine.low %v123_v53, %v127_v54 }
  0x5a   :  { %v2780_v5 = vcombine.high %v130_v61, %v134_v62  ;;  %v2782_v6 = vcombine.high %v131_v0, %v135_v1  ;;  %v138_v7 = vld [vmem:[#allocation5 + $0x200] sm:$0xff]  ;;  %v139_v9 = vld [vmem:[#allocation5 + $0x208] sm:$0xff]  ;;  %v2779_v11 = vcombine.low %v130_v61, %v134_v62  ;;  %v2781_v12 = vcombine.low %v131_v0, %v135_v1 }
  0x5b   :  { %1688 = vmatpush1.bf16.msra.mxu0 %v2747_v34  ;;  %1770 = vmatpush1.bf16.msra.mxu1 %v2749_v38  ;;  %v142_v8 = vld [vmem:[#allocation5 + $0x220] sm:$0xff]  ;;  %v143_v10 = vld [vmem:[#allocation5 + $0x228] sm:$0xff] }
  0x5c   :  { %1689 = vmatprep.subr.bf16.mxu0 %v2756_v39  ;;  %1771 = vmatprep.subr.bf16.mxu1 %v2758_v40  ;;  %v2788_v13 = vcombine.high %v138_v7, %v142_v8  ;;  %v2790_v14 = vcombine.high %v139_v9, %v143_v10  ;;  %v146_v15 = vld [vmem:[#allocation5 + $0x240] sm:$0xff]  ;;  %v147_v17 = vld [vmem:[#allocation5 + $0x248] sm:$0xff]  ;;  %v2787_v19 = vcombine.low %v138_v7, %v142_v8 }
  0x5d   :  { %v150_v16 = vld [vmem:[#allocation5 + $0x260] sm:$0xff]  ;;  %v151_v18 = vld [vmem:[#allocation5 + $0x268] sm:$0xff]  ;;  %v2789_v20 = vcombine.low %v139_v9, %v143_v10 }
  0x5e   :  { %v2796_v21 = vcombine.high %v146_v15, %v150_v16  ;;  %v2798_v22 = vcombine.high %v147_v17, %v151_v18  ;;  %v154_v23 = vld [vmem:[#allocation5 + $0x280] sm:$0xff]  ;;  %v155_v25 = vld [vmem:[#allocation5 + $0x288] sm:$0xff]  ;;  %v2795_v27 = vcombine.low %v146_v15, %v150_v16  ;;  %v2797_v28 = vcombine.low %v147_v17, %v151_v18 }
  0x5f   :  { %1690 = vmatpush1.bf16.msra.mxu0 %v2755_v45  ;;  %1772 = vmatpush1.bf16.msra.mxu1 %v2757_v48  ;;  %v158_v24 = vld [vmem:[#allocation5 + $0x2a0] sm:$0xff]  ;;  %v159_v26 = vld [vmem:[#allocation5 + $0x2a8] sm:$0xff] }
  0x60   :  { %1691 = vmatprep.subr.bf16.mxu0 %v2764_v49  ;;  %1773 = vmatprep.subr.bf16.mxu1 %v2766_v50  ;;  %v2804_v29 = vcombine.high %v154_v23, %v158_v24  ;;  %v2806_v30 = vcombine.high %v155_v25, %v159_v26  ;;  %v162_v31 = vld [vmem:[#allocation5 + $0x2c0] sm:$0xff]  ;;  %v163_v33 = vld [vmem:[#allocation5 + $0x2c8] sm:$0xff]  ;;  %v2803_v35 = vcombine.low %v154_v23, %v158_v24 }
  0x61   :  { %v166_v32 = vld [vmem:[#allocation5 + $0x2e0] sm:$0xff]  ;;  %v167_v34 = vld [vmem:[#allocation5 + $0x2e8] sm:$0xff]  ;;  %v2805_v36 = vcombine.low %v155_v25, %v159_v26 }
  0x62   :  { %v2812_v37 = vcombine.high %v162_v31, %v166_v32  ;;  %v2814_v38 = vcombine.high %v163_v33, %v167_v34  ;;  %v170_v39 = vld [vmem:[#allocation5 + $0x300] sm:$0xff]  ;;  %v171_v41 = vld [vmem:[#allocation5 + $0x308] sm:$0xff]  ;;  %v2811_v43 = vcombine.low %v162_v31, %v166_v32  ;;  %v2813_v44 = vcombine.low %v163_v33, %v167_v34 }
  0x63   :  { %1692 = vmatpush1.bf16.msra.mxu0 %v2763_v55  ;;  %1774 = vmatpush1.bf16.msra.mxu1 %v2765_v57  ;;  %v174_v40 = vld [vmem:[#allocation5 + $0x320] sm:$0xff]  ;;  %v175_v42 = vld [vmem:[#allocation5 + $0x328] sm:$0xff]  ;;  %v3456_v32 = vcombine.high %v3446_v3, %v3446_v3 }
  0x64   :  { %1693 = vmatprep.subr.bf16.mxu0 %v2772_v58  ;;  %1775 = vmatprep.subr.bf16.mxu1 %v2774_v60  ;;  %v2820_v45 = vcombine.high %v170_v39, %v174_v40  ;;  %v2822_v47 = vcombine.high %v171_v41, %v175_v42  ;;  %v178_v48 = vld [vmem:[#allocation5 + $0x340] sm:$0xff]  ;;  %v179_v50 = vld [vmem:[#allocation5 + $0x348] sm:$0xff]  ;;  %v2819_v52 = vcombine.low %v170_v39, %v174_v40 }
  0x65   :  { %v182_v49 = vld [vmem:[#allocation5 + $0x360] sm:$0xff]  ;;  %v183_v51 = vld [vmem:[#allocation5 + $0x368] sm:$0xff]  ;;  %v2821_v53 = vcombine.low %v171_v41, %v175_v42 }
  0x66   :  { %v2828_v54 = vcombine.high %v178_v48, %v182_v49  ;;  %v2830_v55 = vcombine.high %v179_v50, %v183_v51  ;;  %v186_v57 = vld [vmem:[#allocation5 + $0x380] sm:$0xff]  ;;  %v187_v60 = vld [vmem:[#allocation5 + $0x388] sm:$0xff]  ;;  %v2827_v62 = vcombine.low %v178_v48, %v182_v49  ;;  %v2829_v63 = vcombine.low %v179_v50, %v183_v51 }
  0x67   :  { %1694 = vmatpush1.bf16.msra.mxu0 %v2771_v2  ;;  %1776 = vmatpush1.bf16.msra.mxu1 %v2773_v4  ;;  %v190_v58 = vld [vmem:[#allocation5 + $0x3a0] sm:$0xff]  ;;  %v191_v61 = vld [vmem:[#allocation5 + $0x3a8] sm:$0xff] }
  0x68   :  { %1695 = vmatprep.subr.bf16.mxu0 %v2780_v5  ;;  %1777 = vmatprep.subr.bf16.mxu1 %v2782_v6  ;;  %v2836_v0 = vcombine.high %v186_v57, %v190_v58  ;;  %v2838_v1 = vcombine.high %v187_v60, %v191_v61  ;;  %v194_v2 = vld [vmem:[#allocation5 + $0x3c0] sm:$0xff]  ;;  %v195_v5 = vld [vmem:[#allocation5 + $0x3c8] sm:$0xff]  ;;  %v2835_v7 = vcombine.low %v186_v57, %v190_v58 }
  0x69   :  { %v198_v4 = vld [vmem:[#allocation5 + $0x3e0] sm:$0xff]  ;;  %v199_v6 = vld [vmem:[#allocation5 + $0x3e8] sm:$0xff]  ;;  %v2837_v8 = vcombine.low %v187_v60, %v191_v61 }
  0x6a   :  { %v2844_v9 = vcombine.high %v194_v2, %v198_v4  ;;  %v2846_v10 = vcombine.high %v195_v5, %v199_v6  ;;  %v2843_v15 = vcombine.low %v194_v2, %v198_v4  ;;  %v2845_v16 = vcombine.low %v195_v5, %v199_v6  ;;  %v215_v23 = vld [vmem:[#allocation5 + $0x468] sm:$0xff]  ;;  %v226_v34 = vld [vmem:[#allocation5 + $0x4c0] sm:$0xff] }
  0x6b   :  { %1696 = vmatpush1.bf16.msra.mxu0 %v2779_v11  ;;  %1778 = vmatpush1.bf16.msra.mxu1 %v2781_v12  ;;  %v202_v11 = vld [vmem:[#allocation5 + $0x400] sm:$0xff]  ;;  %v223_v31 = vld [vmem:[#allocation5 + $0x4a8] sm:$0xff] }
  0x6c   :  { %1697 = vmatprep.subr.bf16.mxu0 %v2788_v13  ;;  %1779 = vmatprep.subr.bf16.mxu1 %v2790_v14  ;;  %v206_v12 = vld [vmem:[#allocation5 + $0x420] sm:$0xff]  ;;  %v203_v13 = vld [vmem:[#allocation5 + $0x408] sm:$0xff] }
  0x6d   :  { %v207_v14 = vld [vmem:[#allocation5 + $0x428] sm:$0xff]  ;;  %v2852_v17 = vcombine.high %v202_v11, %v206_v12  ;;  %v2851_v24 = vcombine.low %v202_v11, %v206_v12  ;;  %v234_v42 = vld [vmem:[#allocation5 + $0x500] sm:$0xff] }
  0x6e   :  { %v2854_v18 = vcombine.high %v203_v13, %v207_v14  ;;  %v2853_v25 = vcombine.low %v203_v13, %v207_v14  ;;  %v242_v51 = vld [vmem:[#allocation5 + $0x540] sm:$0xff] }
  0x6f   :  { %1698 = vmatpush1.bf16.msra.mxu0 %v2787_v19  ;;  %1780 = vmatpush1.bf16.msra.mxu1 %v2789_v20  ;;  %v210_v19 = vld [vmem:[#allocation5 + $0x440] sm:$0xff] }
  0x70   :  { %1699 = vmatprep.subr.bf16.mxu0 %v2796_v21  ;;  %1781 = vmatprep.subr.bf16.mxu1 %v2798_v22  ;;  %v214_v20 = vld [vmem:[#allocation5 + $0x460] sm:$0xff]  ;;  %v3452_v21 = vrot.slane %v3441_v59, %v3439_v56  ;;  %v211_v22 = vld [vmem:[#allocation5 + $0x448] sm:$0xff] }
  0x71   :  { %v2860_v26 = vcombine.high %v210_v19, %v214_v20  ;;  %v2859_v56 = vcombine.low %v210_v19, %v214_v20  ;;  %v2861_v59 = vcombine.low %v211_v22, %v215_v23  ;;  %v250_v61 = vld [vmem:[#allocation5 + $0x580] sm:$0xff] }
  0x72   :  { %v258_v6 = vld [vmem:[#allocation5 + $0x5c0] sm:$0xff] }
  0x73   :  { %1700 = vmatpush1.bf16.msra.mxu0 %v2795_v27  ;;  %1782 = vmatpush1.bf16.msra.mxu1 %v2797_v28  ;;  %v218_v27 = vld [vmem:[#allocation5 + $0x480] sm:$0xff] }
  0x74   :  { %1701 = vmatprep.subr.bf16.mxu0 %v2804_v29  ;;  %1783 = vmatprep.subr.bf16.mxu1 %v2806_v30  ;;  %v222_v28 = vld [vmem:[#allocation5 + $0x4a0] sm:$0xff]  ;;  %v219_v29 = vld [vmem:[#allocation5 + $0x488] sm:$0xff]  ;;  %v2862_v30 = vcombine.high %v211_v22, %v215_v23 }
  0x75   :  { %v2868_v33 = vcombine.high %v218_v27, %v222_v28  ;;  %v2867_v39 = vcombine.low %v218_v27, %v222_v28  ;;  %v2869_v40 = vcombine.low %v219_v29, %v223_v31  ;;  %v266_v14 = vld [vmem:[#allocation5 + $0x600] sm:$0xff]  ;;  %v279_v27 = vld [vmem:[#allocation5 + $0x668] sm:$0xff] }
  0x76   :  { %v274_v23 = vld [vmem:[#allocation5 + $0x640] sm:$0xff] }
  0x77   :  { %1702 = vmatpush1.bf16.msra.mxu0 %v2803_v35  ;;  %1784 = vmatpush1.bf16.msra.mxu1 %v2805_v36  ;;  %v230_v35 = vld [vmem:[#allocation5 + $0x4e0] sm:$0xff]  ;;  %v227_v36 = vld [vmem:[#allocation5 + $0x4c8] sm:$0xff] }
  0x78   :  { %1703 = vmatprep.subr.bf16.mxu0 %v2812_v37  ;;  %1785 = vmatprep.subr.bf16.mxu1 %v2814_v38  ;;  %v2870_v37 = vcombine.high %v219_v29, %v223_v31  ;;  %v231_v38 = vld [vmem:[#allocation5 + $0x4e8] sm:$0xff]  ;;  %v2876_v41 = vcombine.high %v226_v34, %v230_v35  ;;  %v2875_v48 = vcombine.low %v226_v34, %v230_v35  ;;  %v282_v31 = vld [vmem:[#allocation5 + $0x680] sm:$0xff] }
  0x79   :  { %v2877_v49 = vcombine.low %v227_v36, %v231_v38  ;;  %v287_v34 = vld [vmem:[#allocation5 + $0x6a8] sm:$0xff] }
  0x7b   :  { %1704 = vmatpush1.bf16.msra.mxu0 %v2811_v43  ;;  %1786 = vmatpush1.bf16.msra.mxu1 %v2813_v44  ;;  %v238_v43 = vld [vmem:[#allocation5 + $0x520] sm:$0xff]  ;;  %v235_v44 = vld [vmem:[#allocation5 + $0x508] sm:$0xff] }
  0x7c   :  { %1705 = vmatprep.subr.bf16.mxu0 %v2820_v45  ;;  %1787 = vmatprep.subr.bf16.mxu1 %v2822_v47  ;;  %v2878_v45 = vcombine.high %v227_v36, %v231_v38  ;;  %v239_v47 = vld [vmem:[#allocation5 + $0x528] sm:$0xff]  ;;  %v2884_v50 = vcombine.high %v234_v42, %v238_v43  ;;  %v2883_v57 = vcombine.low %v234_v42, %v238_v43  ;;  %v290_v38 = vld [vmem:[#allocation5 + $0x6c0] sm:$0xff] }
  0x7d   :  { %v2885_v58 = vcombine.low %v235_v44, %v239_v47  ;;  %v295_v42 = vld [vmem:[#allocation5 + $0x6e8] sm:$0xff] }
  0x7f   :  { %1706 = vmatpush1.bf16.msra.mxu0 %v2819_v52  ;;  %1788 = vmatpush1.bf16.msra.mxu1 %v2821_v53  ;;  %v246_v52 = vld [vmem:[#allocation5 + $0x560] sm:$0xff]  ;;  %v243_v53 = vld [vmem:[#allocation5 + $0x548] sm:$0xff] }
  0x80   :  { %1707 = vmatprep.subr.bf16.mxu0 %v2828_v54  ;;  %1789 = vmatprep.subr.bf16.mxu1 %v2830_v55  ;;  %v2886_v54 = vcombine.high %v235_v44, %v239_v47  ;;  %v247_v55 = vld [vmem:[#allocation5 + $0x568] sm:$0xff]  ;;  %v2892_v60 = vcombine.high %v242_v51, %v246_v52  ;;  %v2891_v2 = vcombine.low %v242_v51, %v246_v52  ;;  %v298_v47 = vld [vmem:[#allocation5 + $0x700] sm:$0xff] }
  0x81   :  { %v2893_v4 = vcombine.low %v243_v53, %v247_v55  ;;  %v303_v51 = vld [vmem:[#allocation5 + $0x728] sm:$0xff] }
  0x83   :  { %1708 = vmatpush1.bf16.msra.mxu0 %v2827_v62  ;;  %1790 = vmatpush1.bf16.msra.mxu1 %v2829_v63  ;;  %v254_v62 = vld [vmem:[#allocation5 + $0x5a0] sm:$0xff]  ;;  %v251_v63 = vld [vmem:[#allocation5 + $0x588] sm:$0xff] }
  0x84   :  { %1709 = vmatprep.subr.bf16.mxu0 %v2836_v0  ;;  %1791 = vmatprep.subr.bf16.mxu1 %v2838_v1  ;;  %v2894_v0 = vcombine.high %v243_v53, %v247_v55  ;;  %v255_v1 = vld [vmem:[#allocation5 + $0x5a8] sm:$0xff]  ;;  %v2900_v5 = vcombine.high %v250_v61, %v254_v62  ;;  %v2899_v11 = vcombine.low %v250_v61, %v254_v62  ;;  %v306_v55 = vld [vmem:[#allocation5 + $0x740] sm:$0xff] }
  0x85   :  { %v2901_v12 = vcombine.low %v251_v63, %v255_v1  ;;  %v311_v61 = vld [vmem:[#allocation5 + $0x768] sm:$0xff] }
  0x87   :  { %1710 = vmatpush1.bf16.msra.mxu0 %v2835_v7  ;;  %1792 = vmatpush1.bf16.msra.mxu1 %v2837_v8  ;;  %v262_v7 = vld [vmem:[#allocation5 + $0x5e0] sm:$0xff]  ;;  %v259_v8 = vld [vmem:[#allocation5 + $0x5c8] sm:$0xff] }
  0x88   :  { %1711 = vmatprep.subr.bf16.mxu0 %v2844_v9  ;;  %1793 = vmatprep.subr.bf16.mxu1 %v2846_v10  ;;  %v2902_v9 = vcombine.high %v251_v63, %v255_v1  ;;  %v263_v10 = vld [vmem:[#allocation5 + $0x5e8] sm:$0xff]  ;;  %v2908_v13 = vcombine.high %v258_v6, %v262_v7  ;;  %v2907_v19 = vcombine.low %v258_v6, %v262_v7  ;;  %v314_v1 = vld [vmem:[#allocation5 + $0x780] sm:$0xff] }
  0x89   :  { %v2909_v20 = vcombine.low %v259_v8, %v263_v10  ;;  %v319_v6 = vld [vmem:[#allocation5 + $0x7a8] sm:$0xff] }
  0x8b   :  { %1712 = vmatpush1.bf16.msra.mxu0 %v2843_v15  ;;  %1794 = vmatpush1.bf16.msra.mxu1 %v2845_v16  ;;  %v270_v15 = vld [vmem:[#allocation5 + $0x620] sm:$0xff]  ;;  %v267_v16 = vld [vmem:[#allocation5 + $0x608] sm:$0xff] }
  0x8c   :  { %1722 = vmatprep.subr.bf16.mxu0 %v2852_v17  ;;  %1804 = vmatprep.subr.bf16.mxu1 %v2854_v18  ;;  %v2910_v17 = vcombine.high %v259_v8, %v263_v10  ;;  %v271_v18 = vld [vmem:[#allocation5 + $0x628] sm:$0xff]  ;;  %v2916_v22 = vcombine.high %v266_v14, %v270_v15  ;;  %v2915_v28 = vcombine.low %v266_v14, %v270_v15  ;;  %v322_v10 = vld [vmem:[#allocation5 + $0x7c0] sm:$0xff] }
  0x8d   :  { %v2917_v29 = vcombine.low %v267_v16, %v271_v18  ;;  %v327_v14 = vld [vmem:[#allocation5 + $0x7e8] sm:$0xff] }
  0x8e   :  { %1714 = vmatmul.mubr.bf16.vlgmr.msra.gmra.mrb[0].mxu0 %v3452_v21  ;;  %1796 = vmatmul.mubr.bf16.vlgmr.msra.gmra.mrb[0].mxu1 %v3452_v21 }
  0x8f   :  { %1723 = vmatpush1.bf16.msra.mxu0 %v2851_v24  ;;  %1805 = vmatpush1.bf16.msra.mxu1 %v2853_v25  ;;  %v278_v24 = vld [vmem:[#allocation5 + $0x660] sm:$0xff]  ;;  %v275_v25 = vld [vmem:[#allocation5 + $0x648] sm:$0xff] }
  0x90   :  { %1724 = vmatprep.subr.bf16.mxu0 %v2860_v26  ;;  %1806 = vmatprep.subr.bf16.mxu1 %v2862_v30  ;;  %v2918_v26 = vcombine.high %v267_v16, %v271_v18  ;;  %v2924_v30 = vcombine.high %v274_v23, %v278_v24  ;;  %v2923_v35 = vcombine.low %v274_v23, %v278_v24  ;;  %v76_v18 = vld [vmem:[#allocation5 + $0x10] sm:$0xff]  ;;  %v81_v23 = vld [vmem:[#allocation5 + $0x38] sm:$0xff] }
  0x91   :  { %1754 = vmatprep.mubr.bf16.mxu0 %v3456_v32  ;;  %1836 = vmatprep.mubr.bf16.mxu1 %v3456_v32  ;;  %v2925_v36 = vcombine.low %v275_v25, %v279_v27 }
  0x93   :  { %1725 = vmatpush1.bf16.msra.mxu0 %v2859_v56  ;;  %1807 = vmatpush1.bf16.msra.mxu1 %v2861_v59  ;;  %v286_v56 = vld [vmem:[#allocation5 + $0x6a0] sm:$0xff]  ;;  %v283_v59 = vld [vmem:[#allocation5 + $0x688] sm:$0xff] }
  0x94   :  { %1726 = vmatprep.subr.bf16.mxu0 %v2868_v33  ;;  %1808 = vmatprep.subr.bf16.mxu1 %v2870_v37  ;;  %v2926_v33 = vcombine.high %v275_v25, %v279_v27  ;;  %v2932_v37 = vcombine.high %v282_v31, %v286_v56  ;;  %v2931_v43 = vcombine.low %v282_v31, %v286_v56  ;;  %v84_v27 = vld [vmem:[#allocation5 + $0x50] sm:$0xff]  ;;  %v89_v31 = vld [vmem:[#allocation5 + $0x78] sm:$0xff] }
  0x95   :  { %v2933_v44 = vcombine.low %v283_v59, %v287_v34  ;;  %v3464_v56 = vcombine.high %v3452_v21, %v3452_v21 }
  0x97   :  { %1727 = vmatpush1.bf16.msra.mxu0 %v2867_v39  ;;  %1809 = vmatpush1.bf16.msra.mxu1 %v2869_v40  ;;  %v294_v39 = vld [vmem:[#allocation5 + $0x6e0] sm:$0xff]  ;;  %v291_v40 = vld [vmem:[#allocation5 + $0x6c8] sm:$0xff] }
  0x98   :  { %1728 = vmatprep.subr.bf16.mxu0 %v2876_v41  ;;  %1810 = vmatprep.subr.bf16.mxu1 %v2878_v45  ;;  %v2934_v41 = vcombine.high %v283_v59, %v287_v34  ;;  %v2940_v45 = vcombine.high %v290_v38, %v294_v39  ;;  %v2939_v52 = vcombine.low %v290_v38, %v294_v39  ;;  %v93_v38 = vld [vmem:[#allocation5 + $0x98] sm:$0xff] }
  0x99   :  { %v2941_v53 = vcombine.low %v291_v40, %v295_v42  ;;  %v97_v39 = vld [vmem:[#allocation5 + $0xb8] sm:$0xff] }
  0x9b   :  { %1729 = vmatpush1.bf16.msra.mxu0 %v2875_v48  ;;  %1811 = vmatpush1.bf16.msra.mxu1 %v2877_v49  ;;  %v302_v48 = vld [vmem:[#allocation5 + $0x720] sm:$0xff]  ;;  %v299_v49 = vld [vmem:[#allocation5 + $0x708] sm:$0xff] }
  0x9c   :  { %1730 = vmatprep.subr.bf16.mxu0 %v2884_v50  ;;  %1812 = vmatprep.subr.bf16.mxu1 %v2886_v54  ;;  %v2942_v50 = vcombine.high %v291_v40, %v295_v42  ;;  %v2948_v54 = vcombine.high %v298_v47, %v302_v48  ;;  %v2947_v62 = vcombine.low %v298_v47, %v302_v48  ;;  %v101_v47 = vld [vmem:[#allocation5 + $0xd8] sm:$0xff] }
  0x9d   :  { %v2949_v63 = vcombine.low %v299_v49, %v303_v51  ;;  %v105_v48 = vld [vmem:[#allocation5 + $0xf8] sm:$0xff] }
  0x9f   :  { %1731 = vmatpush1.bf16.msra.mxu0 %v2883_v57  ;;  %1813 = vmatpush1.bf16.msra.mxu1 %v2885_v58  ;;  %v310_v57 = vld [vmem:[#allocation5 + $0x760] sm:$0xff]  ;;  %v307_v58 = vld [vmem:[#allocation5 + $0x748] sm:$0xff] }
  0xa0   :  { %1732 = vmatprep.subr.bf16.mxu0 %v2892_v60  ;;  %1814 = vmatprep.subr.bf16.mxu1 %v2894_v0  ;;  %v2950_v60 = vcombine.high %v299_v49, %v303_v51  ;;  %v2956_v0 = vcombine.high %v306_v55, %v310_v57  ;;  %v2955_v7 = vcombine.low %v306_v55, %v310_v57  ;;  %v109_v55 = vld [vmem:[#allocation5 + $0x118] sm:$0xff] }
  0xa1   :  { %v2957_v8 = vcombine.low %v307_v58, %v311_v61  ;;  %v113_v57 = vld [vmem:[#allocation5 + $0x138] sm:$0xff] }
  0xa3   :  { %1733 = vmatpush1.bf16.msra.mxu0 %v2891_v2  ;;  %1815 = vmatpush1.bf16.msra.mxu1 %v2893_v4  ;;  %v318_v2 = vld [vmem:[#allocation5 + $0x7a0] sm:$0xff]  ;;  %v315_v4 = vld [vmem:[#allocation5 + $0x788] sm:$0xff] }
  0xa4   :  { %1734 = vmatprep.subr.bf16.mxu0 %v2900_v5  ;;  %1816 = vmatprep.subr.bf16.mxu1 %v2902_v9  ;;  %v2958_v5 = vcombine.high %v307_v58, %v311_v61  ;;  %v2964_v9 = vcombine.high %v314_v1, %v318_v2  ;;  %v2963_v15 = vcombine.low %v314_v1, %v318_v2  ;;  %v121_v1 = vld [vmem:[#allocation5 + $0x178] sm:$0xff] }
  0xa5   :  { %v2965_v16 = vcombine.low %v315_v4, %v319_v6 }
  0xa7   :  { %1735 = vmatpush1.bf16.msra.mxu0 %v2899_v11  ;;  %1817 = vmatpush1.bf16.msra.mxu1 %v2901_v12  ;;  %v326_v11 = vld [vmem:[#allocation5 + $0x7e0] sm:$0xff]  ;;  %v323_v12 = vld [vmem:[#allocation5 + $0x7c8] sm:$0xff] }
  0xa8   :  { %1736 = vmatprep.subr.bf16.mxu0 %v2908_v13  ;;  %1818 = vmatprep.subr.bf16.mxu1 %v2910_v17  ;;  %v2966_v13 = vcombine.high %v315_v4, %v319_v6  ;;  %v2972_v17 = vcombine.high %v322_v10, %v326_v11  ;;  %v2971_v24 = vcombine.low %v322_v10, %v326_v11  ;;  %v129_v10 = vld [vmem:[#allocation5 + $0x1b8] sm:$0xff] }
  0xa9   :  { %v2973_v25 = vcombine.low %v323_v12, %v327_v14  ;;  %v2761_v4 = vcombine.low %v109_v55, %v113_v57 }
  0xab   :  { %1737 = vmatpush1.bf16.msra.mxu0 %v2907_v19  ;;  %1819 = vmatpush1.bf16.msra.mxu1 %v2909_v20  ;;  %v80_v19 = vld [vmem:[#allocation5 + $0x30] sm:$0xff]  ;;  %v77_v20 = vld [vmem:[#allocation5 + $0x18] sm:$0xff] }
  0xac   :  { %1738 = vmatprep.subr.bf16.mxu0 %v2916_v22  ;;  %1820 = vmatprep.subr.bf16.mxu1 %v2918_v26  ;;  %v2974_v22 = vcombine.high %v323_v12, %v327_v14  ;;  %v2728_v26 = vcombine.high %v76_v18, %v80_v19  ;;  %v2727_v59 = vcombine.low %v76_v18, %v80_v19  ;;  %v137_v18 = vld [vmem:[#allocation5 + $0x1f8] sm:$0xff] }
  0xaf   :  { %1739 = vmatpush1.bf16.msra.mxu0 %v2915_v28  ;;  %1821 = vmatpush1.bf16.msra.mxu1 %v2917_v29  ;;  %v88_v28 = vld [vmem:[#allocation5 + $0x70] sm:$0xff]  ;;  %v85_v29 = vld [vmem:[#allocation5 + $0x58] sm:$0xff] }
  0xb0   :  { %1740 = vmatprep.subr.bf16.mxu0 %v2924_v30  ;;  %1822 = vmatprep.subr.bf16.mxu1 %v2926_v33  ;;  %v2730_v30 = vcombine.high %v77_v20, %v81_v23  ;;  %v2729_v33 = vcombine.low %v77_v20, %v81_v23  ;;  %v2736_v34 = vcombine.high %v84_v27, %v88_v28 }
  0xb1   :  { %v2735_v40 = vcombine.low %v84_v27, %v88_v28  ;;  %v145_v27 = vld [vmem:[#allocation5 + $0x238] sm:$0xff] }
  0xb3   :  { %1741 = vmatpush1.bf16.msra.mxu0 %v2923_v35  ;;  %1823 = vmatpush1.bf16.msra.mxu1 %v2925_v36  ;;  %v2738_v35 = vcombine.high %v85_v29, %v89_v31  ;;  %v92_v36 = vld [vmem:[#allocation5 + $0x90] sm:$0xff] }
  0xb4   :  { %1742 = vmatprep.subr.bf16.mxu0 %v2932_v37  ;;  %1824 = vmatprep.subr.bf16.mxu1 %v2934_v41  ;;  %v96_v37 = vld [vmem:[#allocation5 + $0xb0] sm:$0xff]  ;;  %v2737_v41 = vcombine.low %v85_v29, %v89_v31 }
  0xb5   :  { %v2744_v42 = vcombine.high %v92_v36, %v96_v37  ;;  %v2743_v49 = vcombine.low %v92_v36, %v96_v37 }
  0xb7   :  { %1743 = vmatpush1.bf16.msra.mxu0 %v2931_v43  ;;  %1825 = vmatpush1.bf16.msra.mxu1 %v2933_v44  ;;  %v2746_v43 = vcombine.high %v93_v38, %v97_v39  ;;  %v100_v44 = vld [vmem:[#allocation5 + $0xd0] sm:$0xff] }
  0xb8   :  { %1744 = vmatprep.subr.bf16.mxu0 %v2940_v45  ;;  %1826 = vmatprep.subr.bf16.mxu1 %v2942_v50  ;;  %v104_v45 = vld [vmem:[#allocation5 + $0xf0] sm:$0xff]  ;;  %v2745_v50 = vcombine.low %v93_v38, %v97_v39 }
  0xb9   :  { %v2752_v51 = vcombine.high %v100_v44, %v104_v45  ;;  %v2751_v58 = vcombine.low %v100_v44, %v104_v45 }
  0xbb   :  { %1745 = vmatpush1.bf16.msra.mxu0 %v2939_v52  ;;  %1827 = vmatpush1.bf16.msra.mxu1 %v2941_v53  ;;  %v2754_v52 = vcombine.high %v101_v47, %v105_v48  ;;  %v108_v53 = vld [vmem:[#allocation5 + $0x110] sm:$0xff] }
  0xbc   :  { %1746 = vmatprep.subr.bf16.mxu0 %v2948_v54  ;;  %1828 = vmatprep.subr.bf16.mxu1 %v2950_v60  ;;  %v112_v54 = vld [vmem:[#allocation5 + $0x130] sm:$0xff]  ;;  %v2753_v60 = vcombine.low %v101_v47, %v105_v48 }
  0xbd   :  { %v2760_v61 = vcombine.high %v108_v53, %v112_v54  ;;  %v2759_v2 = vcombine.low %v108_v53, %v112_v54 }
  0xbf   :  { %1747 = vmatpush1.bf16.msra.mxu0 %v2947_v62  ;;  %1829 = vmatpush1.bf16.msra.mxu1 %v2949_v63  ;;  %v116_v62 = vld [vmem:[#allocation5 + $0x150] sm:$0xff] }
  0xc0   :  { %1748 = vmatprep.subr.bf16.mxu0 %v2956_v0  ;;  %1830 = vmatprep.subr.bf16.mxu1 %v2958_v5  ;;  %v120_v63 = vld [vmem:[#allocation5 + $0x170] sm:$0xff]  ;;  %v117_v0 = vld [vmem:[#allocation5 + $0x158] sm:$0xff] }
  0xc1   :  { %v2768_v5 = vcombine.high %v116_v62, %v120_v63  ;;  %v2770_v6 = vcombine.high %v117_v0, %v121_v1  ;;  %v2767_v11 = vcombine.low %v116_v62, %v120_v63  ;;  %v2769_v12 = vcombine.low %v117_v0, %v121_v1 }
  0xc3   :  { %1749 = vmatpush1.bf16.msra.mxu0 %v2955_v7  ;;  %1831 = vmatpush1.bf16.msra.mxu1 %v2957_v8  ;;  %v124_v7 = vld [vmem:[#allocation5 + $0x190] sm:$0xff] }
  0xc4   :  { %1750 = vmatprep.subr.bf16.mxu0 %v2964_v9  ;;  %1832 = vmatprep.subr.bf16.mxu1 %v2966_v13  ;;  %v128_v8 = vld [vmem:[#allocation5 + $0x1b0] sm:$0xff]  ;;  %v125_v9 = vld [vmem:[#allocation5 + $0x198] sm:$0xff] }
  0xc5   :  { %v2776_v13 = vcombine.high %v124_v7, %v128_v8  ;;  %v2778_v14 = vcombine.high %v125_v9, %v129_v10  ;;  %v2775_v19 = vcombine.low %v124_v7, %v128_v8  ;;  %v2777_v20 = vcombine.low %v125_v9, %v129_v10 }
  0xc7   :  { %1751 = vmatpush1.bf16.msra.mxu0 %v2963_v15  ;;  %1833 = vmatpush1.bf16.msra.mxu1 %v2965_v16  ;;  %v132_v15 = vld [vmem:[#allocation5 + $0x1d0] sm:$0xff] }
  0xc8   :  { %1752 = vmatprep.subr.bf16.mxu0 %v2972_v17  ;;  %1834 = vmatprep.subr.bf16.mxu1 %v2974_v22  ;;  %v136_v16 = vld [vmem:[#allocation5 + $0x1f0] sm:$0xff]  ;;  %v133_v17 = vld [vmem:[#allocation5 + $0x1d8] sm:$0xff] }
  0xc9   :  { %v2784_v22 = vcombine.high %v132_v15, %v136_v16  ;;  %v2786_v23 = vcombine.high %v133_v17, %v137_v18  ;;  %v2783_v28 = vcombine.low %v132_v15, %v136_v16  ;;  %v2785_v29 = vcombine.low %v133_v17, %v137_v18 }
  0xcb   :  { %1753 = vmatpush1.bf16.msra.mxu0 %v2971_v24  ;;  %1835 = vmatpush1.bf16.msra.mxu1 %v2973_v25  ;;  %v140_v24 = vld [vmem:[#allocation5 + $0x210] sm:$0xff] }
  0xcc   :  { %1845 = vmatprep.subr.bf16.mxu0 %v2728_v26  ;;  %1927 = vmatprep.subr.bf16.mxu1 %v2730_v30  ;;  %v144_v25 = vld [vmem:[#allocation5 + $0x230] sm:$0xff]  ;;  %v141_v26 = vld [vmem:[#allocation5 + $0x218] sm:$0xff] }
  0xcd   :  { %v2792_v30 = vcombine.high %v140_v24, %v144_v25  ;;  %v2794_v31 = vcombine.high %v141_v26, %v145_v27  ;;  %v2791_v36 = vcombine.low %v140_v24, %v144_v25  ;;  %v2793_v37 = vcombine.low %v141_v26, %v145_v27 }
  0xce   :  { %1755 = vmatmul.mubr.bf16.vlgmr.msra.gmra.mrb[0].mxu0 %v3464_v56  ;;  %1837 = vmatmul.mubr.bf16.vlgmr.msra.gmra.mrb[0].mxu1 %v3464_v56 }
  0xcf   :  { %1846 = vmatpush1.bf16.msra.mxu0 %v2727_v59  ;;  %1928 = vmatpush1.bf16.msra.mxu1 %v2729_v33  ;;  %v148_v59 = vld [vmem:[#allocation5 + $0x250] sm:$0xff] }
  0xd0   :  { %1847 = vmatprep.subr.bf16.mxu0 %v2736_v34  ;;  %1929 = vmatprep.subr.bf16.mxu1 %v2738_v35  ;;  %v152_v33 = vld [vmem:[#allocation5 + $0x270] sm:$0xff]  ;;  %v149_v34 = vld [vmem:[#allocation5 + $0x258] sm:$0xff] }
  0xd1   :  { %1877 = vmatprep.mubr.bf16.mxu0 %v3446_v3  ;;  %1959 = vmatprep.mubr.bf16.mxu1 %v3446_v3  ;;  %v2762_v3 = vcombine.high %v109_v55, %v113_v57  ;;  %v153_v35 = vld [vmem:[#allocation5 + $0x278] sm:$0xff]  ;;  %v2800_v38 = vcombine.high %v148_v59, %v152_v33  ;;  %v2799_v44 = vcombine.low %v148_v59, %v152_v33 }
  0xd2   :  { %v2802_v39 = vcombine.high %v149_v34, %v153_v35  ;;  %v2801_v45 = vcombine.low %v149_v34, %v153_v35 }
  0xd3   :  { %1848 = vmatpush1.bf16.msra.mxu0 %v2735_v40  ;;  %1930 = vmatpush1.bf16.msra.mxu1 %v2737_v41  ;;  %v156_v40 = vld [vmem:[#allocation5 + $0x290] sm:$0xff] }
  0xd4   :  { %1849 = vmatprep.subr.bf16.mxu0 %v2744_v42  ;;  %1931 = vmatprep.subr.bf16.mxu1 %v2746_v43  ;;  %v160_v41 = vld [vmem:[#allocation5 + $0x2b0] sm:$0xff]  ;;  %v157_v42 = vld [vmem:[#allocation5 + $0x298] sm:$0xff] }
  0xd5   :  { %v161_v43 = vld [vmem:[#allocation5 + $0x2b8] sm:$0xff]  ;;  %v2808_v47 = vcombine.high %v156_v40, %v160_v41  ;;  %v2807_v53 = vcombine.low %v156_v40, %v160_v41 }
  0xd6   :  { %v2810_v48 = vcombine.high %v157_v42, %v161_v43  ;;  %v2809_v54 = vcombine.low %v157_v42, %v161_v43 }
  0xd7   :  { %1850 = vmatpush1.bf16.msra.mxu0 %v2743_v49  ;;  %1932 = vmatpush1.bf16.msra.mxu1 %v2745_v50  ;;  %v164_v49 = vld [vmem:[#allocation5 + $0x2d0] sm:$0xff] }
  0xd8   :  { %1851 = vmatprep.subr.bf16.mxu0 %v2752_v51  ;;  %1933 = vmatprep.subr.bf16.mxu1 %v2754_v52  ;;  %v168_v50 = vld [vmem:[#allocation5 + $0x2f0] sm:$0xff]  ;;  %v165_v51 = vld [vmem:[#allocation5 + $0x2d8] sm:$0xff] }
  0xd9   :  { %v169_v52 = vld [vmem:[#allocation5 + $0x2f8] sm:$0xff]  ;;  %v2816_v55 = vcombine.high %v164_v49, %v168_v50  ;;  %v2815_v62 = vcombine.low %v164_v49, %v168_v50 }
  0xda   :  { %v2818_v57 = vcombine.high %v165_v51, %v169_v52  ;;  %v2817_v63 = vcombine.low %v165_v51, %v169_v52 }
  0xdb   :  { %1852 = vmatpush1.bf16.msra.mxu0 %v2751_v58  ;;  %1934 = vmatpush1.bf16.msra.mxu1 %v2753_v60  ;;  %v172_v58 = vld [vmem:[#allocation5 + $0x310] sm:$0xff] }
  0xdc   :  { %1853 = vmatprep.subr.bf16.mxu0 %v2760_v61  ;;  %1935 = vmatprep.subr.bf16.mxu1 %v2762_v3  ;;  %v176_v60 = vld [vmem:[#allocation5 + $0x330] sm:$0xff]  ;;  %v173_v61 = vld [vmem:[#allocation5 + $0x318] sm:$0xff] }
  0xdd   :  { %v177_v3 = vld [vmem:[#allocation5 + $0x338] sm:$0xff]  ;;  %v2824_v0 = vcombine.high %v172_v58, %v176_v60  ;;  %v2823_v7 = vcombine.low %v172_v58, %v176_v60 }
  0xde   :  { %v2826_v1 = vcombine.high %v173_v61, %v177_v3  ;;  %v2825_v8 = vcombine.low %v173_v61, %v177_v3  ;;  %v236_v3 = vld [vmem:[#allocation5 + $0x510] sm:$0xff] }
  0xdf   :  { %1854 = vmatpush1.bf16.msra.mxu0 %v2759_v2  ;;  %1936 = vmatpush1.bf16.msra.mxu1 %v2761_v4  ;;  %v180_v2 = vld [vmem:[#allocation5 + $0x350] sm:$0xff] }
  0xe0   :  { %1855 = vmatprep.subr.bf16.mxu0 %v2768_v5  ;;  %1937 = vmatprep.subr.bf16.mxu1 %v2770_v6  ;;  %v184_v4 = vld [vmem:[#allocation5 + $0x370] sm:$0xff]  ;;  %v181_v5 = vld [vmem:[#allocation5 + $0x358] sm:$0xff] }
  0xe1   :  { %v185_v6 = vld [vmem:[#allocation5 + $0x378] sm:$0xff]  ;;  %v2832_v9 = vcombine.high %v180_v2, %v184_v4  ;;  %v2831_v15 = vcombine.low %v180_v2, %v184_v4 }
  0xe2   :  { %v2834_v10 = vcombine.high %v181_v5, %v185_v6  ;;  %v2833_v16 = vcombine.low %v181_v5, %v185_v6  ;;  %v244_v5 = vld [vmem:[#allocation5 + $0x550] sm:$0xff] }
  0xe3   :  { %1856 = vmatpush1.bf16.msra.mxu0 %v2767_v11  ;;  %1938 = vmatpush1.bf16.msra.mxu1 %v2769_v12  ;;  %v188_v11 = vld [vmem:[#allocation5 + $0x390] sm:$0xff] }
  0xe4   :  { %1857 = vmatprep.subr.bf16.mxu0 %v2776_v13  ;;  %1939 = vmatprep.subr.bf16.mxu1 %v2778_v14  ;;  %v192_v12 = vld [vmem:[#allocation5 + $0x3b0] sm:$0xff]  ;;  %v189_v13 = vld [vmem:[#allocation5 + $0x398] sm:$0xff] }
  0xe5   :  { %v193_v14 = vld [vmem:[#allocation5 + $0x3b8] sm:$0xff]  ;;  %v2840_v17 = vcombine.high %v188_v11, %v192_v12  ;;  %v2839_v24 = vcombine.low %v188_v11, %v192_v12  ;;  %v248_v6 = vld [vmem:[#allocation5 + $0x570] sm:$0xff] }
  0xe6   :  { %v2842_v18 = vcombine.high %v189_v13, %v193_v14  ;;  %v2841_v25 = vcombine.low %v189_v13, %v193_v14  ;;  %v2896_v11 = vcombine.high %v244_v5, %v248_v6  ;;  %v252_v13 = vld [vmem:[#allocation5 + $0x590] sm:$0xff] }
  0xe7   :  { %1858 = vmatpush1.bf16.msra.mxu0 %v2775_v19  ;;  %1940 = vmatpush1.bf16.msra.mxu1 %v2777_v20  ;;  %v196_v19 = vld [vmem:[#allocation5 + $0x3d0] sm:$0xff] }
  0xe8   :  { %1859 = vmatprep.subr.bf16.mxu0 %v2784_v22  ;;  %1941 = vmatprep.subr.bf16.mxu1 %v2786_v23  ;;  %v200_v20 = vld [vmem:[#allocation5 + $0x3f0] sm:$0xff]  ;;  %v197_v22 = vld [vmem:[#allocation5 + $0x3d8] sm:$0xff] }
  0xe9   :  { %v201_v23 = vld [vmem:[#allocation5 + $0x3f8] sm:$0xff]  ;;  %v2848_v26 = vcombine.high %v196_v19, %v200_v20  ;;  %v2847_v59 = vcombine.low %v196_v19, %v200_v20  ;;  %v256_v14 = vld [vmem:[#allocation5 + $0x5b0] sm:$0xff] }
  0xea   :  { %v2850_v27 = vcombine.high %v197_v22, %v201_v23  ;;  %v2849_v33 = vcombine.low %v197_v22, %v201_v23  ;;  %v2904_v19 = vcombine.high %v252_v13, %v256_v14  ;;  %v260_v22 = vld [vmem:[#allocation5 + $0x5d0] sm:$0xff] }
  0xeb   :  { %1860 = vmatpush1.bf16.msra.mxu0 %v2783_v28  ;;  %1942 = vmatpush1.bf16.msra.mxu1 %v2785_v29  ;;  %v204_v28 = vld [vmem:[#allocation5 + $0x410] sm:$0xff] }
  0xec   :  { %1861 = vmatprep.subr.bf16.mxu0 %v2792_v30  ;;  %1943 = vmatprep.subr.bf16.mxu1 %v2794_v31  ;;  %v208_v29 = vld [vmem:[#allocation5 + $0x430] sm:$0xff]  ;;  %v205_v30 = vld [vmem:[#allocation5 + $0x418] sm:$0xff] }
  0xed   :  { %v209_v31 = vld [vmem:[#allocation5 + $0x438] sm:$0xff]  ;;  %v2856_v34 = vcombine.high %v204_v28, %v208_v29  ;;  %v2855_v40 = vcombine.low %v204_v28, %v208_v29  ;;  %v264_v23 = vld [vmem:[#allocation5 + $0x5f0] sm:$0xff] }
  0xee   :  { %v2858_v35 = vcombine.high %v205_v30, %v209_v31  ;;  %v2857_v41 = vcombine.low %v205_v30, %v209_v31  ;;  %v2912_v28 = vcombine.high %v260_v22, %v264_v23  ;;  %v268_v30 = vld [vmem:[#allocation5 + $0x610] sm:$0xff] }
  0xef   :  { %1862 = vmatpush1.bf16.msra.mxu0 %v2791_v36  ;;  %1944 = vmatpush1.bf16.msra.mxu1 %v2793_v37  ;;  %v212_v36 = vld [vmem:[#allocation5 + $0x450] sm:$0xff] }
  0xf0   :  { %1863 = vmatprep.subr.bf16.mxu0 %v2800_v38  ;;  %1945 = vmatprep.subr.bf16.mxu1 %v2802_v39  ;;  %v216_v37 = vld [vmem:[#allocation5 + $0x470] sm:$0xff]  ;;  %v213_v38 = vld [vmem:[#allocation5 + $0x458] sm:$0xff] }
  0xf1   :  { %v217_v39 = vld [vmem:[#allocation5 + $0x478] sm:$0xff]  ;;  %v2864_v42 = vcombine.high %v212_v36, %v216_v37  ;;  %v2863_v49 = vcombine.low %v212_v36, %v216_v37  ;;  %v272_v31 = vld [vmem:[#allocation5 + $0x630] sm:$0xff] }
  0xf2   :  { %v2866_v43 = vcombine.high %v213_v38, %v217_v39  ;;  %v2865_v50 = vcombine.low %v213_v38, %v217_v39  ;;  %v2920_v36 = vcombine.high %v268_v30, %v272_v31  ;;  %v276_v38 = vld [vmem:[#allocation5 + $0x650] sm:$0xff] }
  0xf3   :  { %1864 = vmatpush1.bf16.msra.mxu0 %v2799_v44  ;;  %1946 = vmatpush1.bf16.msra.mxu1 %v2801_v45  ;;  %v220_v44 = vld [vmem:[#allocation5 + $0x490] sm:$0xff] }
  0xf4   :  { %1865 = vmatprep.subr.bf16.mxu0 %v2808_v47  ;;  %1947 = vmatprep.subr.bf16.mxu1 %v2810_v48  ;;  %v224_v45 = vld [vmem:[#allocation5 + $0x4b0] sm:$0xff]  ;;  %v221_v47 = vld [vmem:[#allocation5 + $0x498] sm:$0xff] }
  0xf5   :  { %v225_v48 = vld [vmem:[#allocation5 + $0x4b8] sm:$0xff]  ;;  %v2872_v51 = vcombine.high %v220_v44, %v224_v45  ;;  %v2871_v58 = vcombine.low %v220_v44, %v224_v45  ;;  %v280_v39 = vld [vmem:[#allocation5 + $0x670] sm:$0xff] }
  0xf6   :  { %v2874_v52 = vcombine.high %v221_v47, %v225_v48  ;;  %v2928_v44 = vcombine.high %v276_v38, %v280_v39 }
  0xf7   :  { %1866 = vmatpush1.bf16.msra.mxu0 %v2807_v53  ;;  %1948 = vmatpush1.bf16.msra.mxu1 %v2809_v54  ;;  %v228_v53 = vld [vmem:[#allocation5 + $0x4d0] sm:$0xff] }
  0xf8   :  { %1867 = vmatprep.subr.bf16.mxu0 %v2816_v55  ;;  %1949 = vmatprep.subr.bf16.mxu1 %v2818_v57  ;;  %v232_v54 = vld [vmem:[#allocation5 + $0x4f0] sm:$0xff]  ;;  %v229_v55 = vld [vmem:[#allocation5 + $0x4d8] sm:$0xff] }
  0xf9   :  { %v233_v57 = vld [vmem:[#allocation5 + $0x4f8] sm:$0xff]  ;;  %v2880_v60 = vcombine.high %v228_v53, %v232_v54 }
  0xfa   :  { %v2882_v61 = vcombine.high %v229_v55, %v233_v57  ;;  %v2881_v2 = vcombine.low %v229_v55, %v233_v57  ;;  %v292_v55 = vld [vmem:[#allocation5 + $0x6d0] sm:$0xff] }
  0xfb   :  { %1868 = vmatpush1.bf16.msra.mxu0 %v2815_v62  ;;  %1950 = vmatpush1.bf16.msra.mxu1 %v2817_v63  ;;  %v240_v62 = vld [vmem:[#allocation5 + $0x530] sm:$0xff]  ;;  %v237_v63 = vld [vmem:[#allocation5 + $0x518] sm:$0xff] }
  0xfc   :  { %1869 = vmatprep.subr.bf16.mxu0 %v2824_v0  ;;  %1951 = vmatprep.subr.bf16.mxu1 %v2826_v1  ;;  %v241_v0 = vld [vmem:[#allocation5 + $0x538] sm:$0xff]  ;;  %v2879_v1 = vcombine.low %v228_v53, %v232_v54  ;;  %v2888_v4 = vcombine.high %v236_v3, %v240_v62  ;;  %v296_v57 = vld [vmem:[#allocation5 + $0x6f0] sm:$0xff] }
  0xff   :  { %1870 = vmatpush1.bf16.msra.mxu0 %v2823_v7  ;;  %1952 = vmatpush1.bf16.msra.mxu1 %v2825_v8  ;;  %v245_v7 = vld [vmem:[#allocation5 + $0x558] sm:$0xff] }
 0x100   :  { %1871 = vmatprep.subr.bf16.mxu0 %v2832_v9  ;;  %1953 = vmatprep.subr.bf16.mxu1 %v2834_v10  ;;  %v249_v8 = vld [vmem:[#allocation5 + $0x578] sm:$0xff]  ;;  %v2887_v9 = vcombine.low %v236_v3, %v240_v62  ;;  %v2889_v10 = vcombine.low %v237_v63, %v241_v0  ;;  %v2944_v3 = vcombine.high %v292_v55, %v296_v57 }
 0x101   :  { %v2898_v12 = vcombine.high %v245_v7, %v249_v8 }
 0x103   :  { %1872 = vmatpush1.bf16.msra.mxu0 %v2831_v15  ;;  %1954 = vmatpush1.bf16.msra.mxu1 %v2833_v16  ;;  %v253_v15 = vld [vmem:[#allocation5 + $0x598] sm:$0xff] }
 0x104   :  { %1873 = vmatprep.subr.bf16.mxu0 %v2840_v17  ;;  %1955 = vmatprep.subr.bf16.mxu1 %v2842_v18  ;;  %v257_v16 = vld [vmem:[#allocation5 + $0x5b8] sm:$0xff]  ;;  %v2895_v17 = vcombine.low %v244_v5, %v248_v6  ;;  %v2897_v18 = vcombine.low %v245_v7, %v249_v8  ;;  %v308_v7 = vld [vmem:[#allocation5 + $0x750] sm:$0xff] }
 0x105   :  { %v2906_v20 = vcombine.high %v253_v15, %v257_v16  ;;  %v312_v8 = vld [vmem:[#allocation5 + $0x770] sm:$0xff] }
 0x107   :  { %1874 = vmatpush1.bf16.msra.mxu0 %v2839_v24  ;;  %1956 = vmatpush1.bf16.msra.mxu1 %v2841_v25  ;;  %v261_v24 = vld [vmem:[#allocation5 + $0x5d8] sm:$0xff] }
 0x108   :  { %1875 = vmatprep.subr.bf16.mxu0 %v2848_v26  ;;  %1957 = vmatprep.subr.bf16.mxu1 %v2850_v27  ;;  %v265_v25 = vld [vmem:[#allocation5 + $0x5f8] sm:$0xff]  ;;  %v2903_v26 = vcombine.low %v252_v13, %v256_v14  ;;  %v2905_v27 = vcombine.low %v253_v15, %v257_v16  ;;  %v2960_v13 = vcombine.high %v308_v7, %v312_v8  ;;  %v316_v15 = vld [vmem:[#allocation5 + $0x790] sm:$0xff] }
 0x109   :  { %v2914_v29 = vcombine.high %v261_v24, %v265_v25  ;;  %v320_v16 = vld [vmem:[#allocation5 + $0x7b0] sm:$0xff] }
 0x10b   :  { %1876 = vmatpush1.bf16.msra.mxu0 %v2847_v59  ;;  %1958 = vmatpush1.bf16.msra.mxu1 %v2849_v33  ;;  %v269_v59 = vld [vmem:[#allocation5 + $0x618] sm:$0xff] }
 0x10c   :  { %1886 = vmatprep.subr.bf16.mxu0 %v2856_v34  ;;  %1968 = vmatprep.subr.bf16.mxu1 %v2858_v35  ;;  %v273_v33 = vld [vmem:[#allocation5 + $0x638] sm:$0xff]  ;;  %v2911_v34 = vcombine.low %v260_v22, %v264_v23  ;;  %v2913_v35 = vcombine.low %v261_v24, %v265_v25  ;;  %v2968_v22 = vcombine.high %v316_v15, %v320_v16  ;;  %v324_v24 = vld [vmem:[#allocation5 + $0x7d0] sm:$0xff] }
 0x10d   :  { %v2922_v37 = vcombine.high %v269_v59, %v273_v33  ;;  %v328_v25 = vld [vmem:[#allocation5 + $0x7f0] sm:$0xff] }
 0x10e   :  { %1878 = vmatmul.mubr.bf16.vlgmr.msra.gmra.mrb[4].mxu0 %v3452_v21  ;;  %1960 = vmatmul.mubr.bf16.vlgmr.msra.gmra.mrb[4].mxu1 %v3452_v21  ;;  %v2873_v21 = vcombine.low %v221_v47, %v225_v48  ;;  %v284_v47 = vld [vmem:[#allocation5 + $0x690] sm:$0xff] }
 0x10f   :  { %1887 = vmatpush1.bf16.msra.mxu0 %v2855_v40  ;;  %1969 = vmatpush1.bf16.msra.mxu1 %v2857_v41  ;;  %v277_v40 = vld [vmem:[#allocation5 + $0x658] sm:$0xff]  ;;  %v288_v48 = vld [vmem:[#allocation5 + $0x6b0] sm:$0xff] }
 0x110   :  { %1888 = vmatprep.subr.bf16.mxu0 %v2864_v42  ;;  %1970 = vmatprep.subr.bf16.mxu1 %v2866_v43  ;;  %v281_v41 = vld [vmem:[#allocation5 + $0x678] sm:$0xff]  ;;  %v2919_v42 = vcombine.low %v268_v30, %v272_v31  ;;  %v2921_v43 = vcombine.low %v269_v59, %v273_v33  ;;  %v2936_v53 = vcombine.high %v284_v47, %v288_v48 }
 0x111   :  { %1918 = vmatprep.mubr.bf16.mxu0 %v3456_v32  ;;  %2000 = vmatprep.mubr.bf16.mxu1 %v3456_v32  ;;  %v2890_v32 = vcombine.high %v237_v63, %v241_v0  ;;  %v2930_v45 = vcombine.high %v277_v40, %v281_v41  ;;  %v300_v63 = vld [vmem:[#allocation5 + $0x710] sm:$0xff]  ;;  %v2976_v30 = vcombine.high %v324_v24, %v328_v25 }
 0x112   :  { %v304_v0 = vld [vmem:[#allocation5 + $0x730] sm:$0xff]  ;;  %v2975_v59 = vcombine.low %v324_v24, %v328_v25 }
 0x113   :  { %1889 = vmatpush1.bf16.msra.mxu0 %v2863_v49  ;;  %1971 = vmatpush1.bf16.msra.mxu1 %v2865_v50  ;;  %v285_v49 = vld [vmem:[#allocation5 + $0x698] sm:$0xff]  ;;  %v2952_v5 = vcombine.high %v300_v63, %v304_v0 }
 0x114   :  { %1890 = vmatprep.subr.bf16.mxu0 %v2872_v51  ;;  %1972 = vmatprep.subr.bf16.mxu1 %v2874_v52  ;;  %v289_v50 = vld [vmem:[#allocation5 + $0x6b8] sm:$0xff]  ;;  %v2927_v51 = vcombine.low %v276_v38, %v280_v39  ;;  %v2929_v52 = vcombine.low %v277_v40, %v281_v41  ;;  %v3170_v38 = vld [vmem:[#allocation8 + $0x48] sm:$0xff]  }
 0x115   :  { %v2938_v54 = vcombine.high %v285_v49, %v289_v50  ;;  %v3171_v39 = vld [vmem:[#allocation8 + $0xc8] sm:$0xff]  }
 0x116   :  { %v3172_v40 = vld [vmem:[#allocation8 + $0x8] sm:$0xff]  }
 0x117   :  { %1891 = vmatpush1.bf16.msra.mxu0 %v2871_v58  ;;  %1973 = vmatpush1.bf16.msra.mxu1 %v2873_v21  ;;  %v293_v58 = vld [vmem:[#allocation5 + $0x6d8] sm:$0xff]  ;;  %v3173_v41 = vld [vmem:[#allocation8 + $0x88] sm:$0xff]  }
 0x118   :  { %1892 = vmatprep.subr.bf16.mxu0 %v2880_v60  ;;  %1974 = vmatprep.subr.bf16.mxu1 %v2882_v61  ;;  %v297_v21 = vld [vmem:[#allocation5 + $0x6f8] sm:$0xff]  ;;  %v2935_v60 = vcombine.low %v284_v47, %v288_v48  ;;  %v2937_v61 = vcombine.low %v285_v49, %v289_v50  ;;  %v3178_v47 = vld [vmem:[#allocation8 + $0x58] sm:$0xff]   ;;  %v3182_v50 = vld [vmem:[#allocation8 + $0x60] sm:$0xff]  }
 0x119   :  { %v2946_v62 = vcombine.high %v293_v58, %v297_v21  ;;  %v3179_v48 = vld [vmem:[#allocation8 + $0xd8] sm:$0xff]  }
 0x11a   :  { %v3180_v49 = vld [vmem:[#allocation8 + $0x18] sm:$0xff]  }
 0x11b   :  { %1893 = vmatpush1.bf16.msra.mxu0 %v2879_v1  ;;  %1975 = vmatpush1.bf16.msra.mxu1 %v2881_v2  ;;  %v301_v1 = vld [vmem:[#allocation5 + $0x718] sm:$0xff] }
 0x11c   :  { %1894 = vmatprep.subr.bf16.mxu0 %v2888_v4  ;;  %1976 = vmatprep.subr.bf16.mxu1 %v2890_v32  ;;  %v305_v2 = vld [vmem:[#allocation5 + $0x738] sm:$0xff]  ;;  %v2943_v4 = vcombine.low %v292_v55, %v296_v57  ;;  %v2945_v32 = vcombine.low %v293_v58, %v297_v21  ;;  %v3187_v55 = vld [vmem:[#allocation8 + $0xe8] sm:$0xff]  }
 0x11d   :  { %v2954_v6 = vcombine.high %v301_v1, %v305_v2  ;;  %v3188_v57 = vld [vmem:[#allocation8 + $0x28] sm:$0xff]   ;;  %v3190_v21 = vld [vmem:[#allocation8 + $0x70] sm:$0xff]  }
 0x11e   :  { %v3189_v58 = vld [vmem:[#allocation8 + $0xa8] sm:$0xff]  }
 0x11f   :  { %1895 = vmatpush1.bf16.msra.mxu0 %v2887_v9  ;;  %1977 = vmatpush1.bf16.msra.mxu1 %v2889_v10  ;;  %v309_v9 = vld [vmem:[#allocation5 + $0x758] sm:$0xff] }
 0x120   :  { %1896 = vmatprep.subr.bf16.mxu0 %v2896_v11  ;;  %1978 = vmatprep.subr.bf16.mxu1 %v2898_v12  ;;  %v313_v10 = vld [vmem:[#allocation5 + $0x778] sm:$0xff]  ;;  %v2951_v11 = vcombine.low %v300_v63, %v304_v0  ;;  %v2953_v12 = vcombine.low %v301_v1, %v305_v2  ;;  %v3195_v63 = vld [vmem:[#allocation8 + $0xf8] sm:$0xff]   ;;  %v3198_v2 = vld [vmem:[#allocation8 + $0x140] sm:$0xff]  }
 0x121   :  { %v2962_v14 = vcombine.high %v309_v9, %v313_v10  ;;  %v3196_v0 = vld [vmem:[#allocation8 + $0x38] sm:$0xff]  }
 0x122   :  { %v3197_v1 = vld [vmem:[#allocation8 + $0xb8] sm:$0xff]  }
 0x123   :  { %1897 = vmatpush1.bf16.msra.mxu0 %v2895_v17  ;;  %1979 = vmatpush1.bf16.msra.mxu1 %v2897_v18  ;;  %v317_v17 = vld [vmem:[#allocation5 + $0x798] sm:$0xff] }
 0x124   :  { %1898 = vmatprep.subr.bf16.mxu0 %v2904_v19  ;;  %1980 = vmatprep.subr.bf16.mxu1 %v2906_v20  ;;  %v321_v18 = vld [vmem:[#allocation5 + $0x7b8] sm:$0xff]  ;;  %v2959_v19 = vcombine.low %v308_v7, %v312_v8  ;;  %v2961_v20 = vcombine.low %v309_v9, %v313_v10  ;;  %v338_v7 = vsub.s32 1, %v3436_v46  ;;  %v346_v8 = vsub.s32 3, %v3436_v46 }
 0x125   :  { %v2970_v23 = vcombine.high %v317_v17, %v321_v18 }
 0x127   :  { %1899 = vmatpush1.bf16.msra.mxu0 %v2903_v26  ;;  %1981 = vmatpush1.bf16.msra.mxu1 %v2905_v27  ;;  %v325_v26 = vld [vmem:[#allocation5 + $0x7d8] sm:$0xff] }
 0x128   :  { %1900 = vmatprep.subr.bf16.mxu0 %v2912_v28  ;;  %1982 = vmatprep.subr.bf16.mxu1 %v2914_v29  ;;  %v329_v27 = vld [vmem:[#allocation5 + $0x7f8] sm:$0xff]  ;;  %v2967_v28 = vcombine.low %v316_v15, %v320_v16  ;;  %v2969_v29 = vcombine.low %v317_v17, %v321_v18 }
 0x129   :  { %v2978_v31 = vcombine.high %v325_v26, %v329_v27  ;;  %v2977_v33 = vcombine.low %v325_v26, %v329_v27 }
 0x12b   :  { %1901 = vmatpush1.bf16.msra.mxu0 %v2911_v34  ;;  %1983 = vmatpush1.bf16.msra.mxu1 %v2913_v35  ;;  %v3166_v34 = vld [vmem:[#allocation8 + $0x40] sm:$0xff]  }
 0x12c   :  { %1902 = vmatprep.subr.bf16.mxu0 %v2920_v36  ;;  %1984 = vmatprep.subr.bf16.mxu1 %v2922_v37  ;;  %v3167_v35 = vld [vmem:[#allocation8 + $0xc0] sm:$0xff]  }
 0x12d   :  { %v3168_v36 = vld [vmem:[#allocation8] sm:$0xff]  }
 0x12e   :  { %v3169_v37 = vld [vmem:[#allocation8 + $0x80] sm:$0xff]  }
 0x12f   :  { %1903 = vmatpush1.bf16.msra.mxu0 %v2919_v42  ;;  %1985 = vmatpush1.bf16.msra.mxu1 %v2921_v43  ;;  %v3174_v42 = vld [vmem:[#allocation8 + $0x50] sm:$0xff]  }
 0x130   :  { %1904 = vmatprep.subr.bf16.mxu0 %v2928_v44  ;;  %1986 = vmatprep.subr.bf16.mxu1 %v2930_v45  ;;  %v3175_v43 = vld [vmem:[#allocation8 + $0xd0] sm:$0xff]  }
 0x131   :  { %v3176_v44 = vld [vmem:[#allocation8 + $0x10] sm:$0xff]  }
 0x132   :  { %v3177_v45 = vld [vmem:[#allocation8 + $0x90] sm:$0xff]  }
 0x133   :  { %1905 = vmatpush1.bf16.msra.mxu0 %v2927_v51  ;;  %1987 = vmatpush1.bf16.msra.mxu1 %v2929_v52  ;;  %v3183_v51 = vld [vmem:[#allocation8 + $0xe0] sm:$0xff]  }
 0x134   :  { %1906 = vmatprep.subr.bf16.mxu0 %v2936_v53  ;;  %1988 = vmatprep.subr.bf16.mxu1 %v2938_v54  ;;  %v3184_v52 = vld [vmem:[#allocation8 + $0x20] sm:$0xff]   ;;  %v3186_v54 = vld [vmem:[#allocation8 + $0x68] sm:$0xff]  }
 0x135   :  { %v3185_v53 = vld [vmem:[#allocation8 + $0xa0] sm:$0xff]  }
 0x137   :  { %1907 = vmatpush1.bf16.msra.mxu0 %v2935_v60  ;;  %1989 = vmatpush1.bf16.msra.mxu1 %v2937_v61  ;;  %v3191_v60 = vld [vmem:[#allocation8 + $0xf0] sm:$0xff]  }
 0x138   :  { %1908 = vmatprep.subr.bf16.mxu0 %v2944_v3  ;;  %1990 = vmatprep.subr.bf16.mxu1 %v2946_v62  ;;  %v3192_v61 = vld [vmem:[#allocation8 + $0x30] sm:$0xff]   ;;  %v3194_v62 = vld [vmem:[#allocation8 + $0x78] sm:$0xff]  }
 0x139   :  { %v3193_v3 = vld [vmem:[#allocation8 + $0xb0] sm:$0xff]  }
 0x13b   :  { %1909 = vmatpush1.bf16.msra.mxu0 %v2943_v4  ;;  %1991 = vmatpush1.bf16.msra.mxu1 %v2945_v32  ;;  %v3199_v4 = vld [vmem:[#allocation8 + $0x1c0] sm:$0xff]   ;;  %v334_v32 = vsub.s32 0, %v3436_v46 }
 0x13c   :  { %1910 = vmatprep.subr.bf16.mxu0 %v2952_v5  ;;  %1992 = vmatprep.subr.bf16.mxu1 %v2954_v6  ;;  %v3477_v5 = vld [vmem:[#allocation7] sm:$0xff]  ;;  %v342_v6 = vsub.s32 2, %v3436_v46 }
 0x13d   :  { %v335_v9 = vrot.slane %v3477_v5, %v334_v32 }
 0x13e   :  { %v343_v10 = vrot.slane %v3477_v5, %v342_v6 }
 0x13f   :  { %1911 = vmatpush1.bf16.msra.mxu0 %v2951_v11  ;;  %1993 = vmatpush1.bf16.msra.mxu1 %v2953_v12  ;;  %v339_v11 = vrot.slane %v3477_v5, %v338_v7  ;;  %v347_v12 = vrot.slane %v3477_v5, %v346_v8 }
 0x140   :  { %1912 = vmatprep.subr.bf16.mxu0 %v2960_v13  ;;  %1994 = vmatprep.subr.bf16.mxu1 %v2962_v14 }
 0x143   :  { %1913 = vmatpush1.bf16.msra.mxu0 %v2959_v19  ;;  %1995 = vmatpush1.bf16.msra.mxu1 %v2961_v20 }
 0x144   :  { %1914 = vmatprep.subr.bf16.mxu0 %v2968_v22  ;;  %1996 = vmatprep.subr.bf16.mxu1 %v2970_v23 }
 0x147   :  { %1915 = vmatpush1.bf16.msra.mxu0 %v2967_v28  ;;  %1997 = vmatpush1.bf16.msra.mxu1 %v2969_v29 }
 0x148   :  { %1916 = vmatprep.subr.bf16.mxu0 %v2976_v30  ;;  %1998 = vmatprep.subr.bf16.mxu1 %v2978_v31  ;;  %v3200_v31 = vld [vmem:[#allocation8 + $0x100] sm:$0xff]  }
 0x14b   :  { %1917 = vmatpush1.bf16.msra.mxu0 %v2975_v59  ;;  %1999 = vmatpush1.bf16.msra.mxu1 %v2977_v33 }
 0x14c   :  { %3044 = vmatprep.subr.bf16.mxu0 %v3166_v34  ;;  %3066 = vmatprep.subr.bf16.mxu1 %v3167_v35  ;;  %v3201_v34 = vld [vmem:[#allocation8 + $0x180] sm:$0xff]   ;;  %v3202_v35 = vld [vmem:[#allocation8 + $0x148] sm:$0xff]  }
 0x14e   :  { %1919 = vmatmul.mubr.bf16.vlgmr.msra.gmra.mrb[4].mxu0 %v3464_v56  ;;  %2001 = vmatmul.mubr.bf16.vlgmr.msra.gmra.mrb[4].mxu1 %v3464_v56  ;;  %v3181_v56 = vld [vmem:[#allocation8 + $0x98] sm:$0xff]  }
 0x14f   :  { %3045 = vmatpush3.bf16.msra.mxu0 %v3168_v36  ;;  %3067 = vmatpush3.bf16.msra.mxu1 %v3169_v37  ;;  %v3203_v37 = vld [vmem:[#allocation8 + $0x1c8] sm:$0xff]  }
 0x150   :  { %3046 = vmatprep.subr.bf16.mxu0 %v3170_v38  ;;  %3068 = vmatprep.subr.bf16.mxu1 %v3171_v39  ;;  %v3204_v38 = vld [vmem:[#allocation8 + $0x108] sm:$0xff]  }
 0x151   :  { %v3205_v39 = vld [vmem:[#allocation8 + $0x188] sm:$0xff]  }
 0x153   :  { %3047 = vmatpush3.bf16.msra.mxu0 %v3172_v40  ;;  %3069 = vmatpush3.bf16.msra.mxu1 %v3173_v41  ;;  %v3206_v40 = vld [vmem:[#allocation8 + $0x150] sm:$0xff]  }
 0x154   :  { %3048 = vmatprep.subr.bf16.mxu0 %v3174_v42  ;;  %3070 = vmatprep.subr.bf16.mxu1 %v3175_v43  ;;  %v3207_v41 = vld [vmem:[#allocation8 + $0x1d0] sm:$0xff]  }
 0x155   :  { %v3208_v42 = vld [vmem:[#allocation8 + $0x110] sm:$0xff]  }
 0x156   :  { %v3209_v43 = vld [vmem:[#allocation8 + $0x190] sm:$0xff]  }
 0x157   :  { %3049 = vmatpush3.bf16.msra.mxu0 %v3176_v44  ;;  %3071 = vmatpush3.bf16.msra.mxu1 %v3177_v45  ;;  %v3210_v44 = vld [vmem:[#allocation8 + $0x158] sm:$0xff]  }
 0x158   :  { %3050 = vmatprep.subr.bf16.mxu0 %v3178_v47  ;;  %3072 = vmatprep.subr.bf16.mxu1 %v3179_v48  ;;  %v3211_v45 = vld [vmem:[#allocation8 + $0x1d8] sm:$0xff]  }
 0x159   :  { %v3212_v47 = vld [vmem:[#allocation8 + $0x118] sm:$0xff]  }
 0x15a   :  { %v3213_v48 = vld [vmem:[#allocation8 + $0x198] sm:$0xff]  }
 0x15b   :  { %3051 = vmatpush3.bf16.msra.mxu0 %v3180_v49  ;;  %3073 = vmatpush3.bf16.msra.mxu1 %v3181_v56  ;;  %v3214_v49 = vld [vmem:[#allocation8 + $0x160] sm:$0xff]  }
 0x15c   :  { %3052 = vmatprep.subr.bf16.mxu0 %v3182_v50  ;;  %3074 = vmatprep.subr.bf16.mxu1 %v3183_v51  ;;  %v3215_v56 = vld [vmem:[#allocation8 + $0x1e0] sm:$0xff]  }
 0x15d   :  { %v3216_v50 = vld [vmem:[#allocation8 + $0x120] sm:$0xff]  }
 0x15e   :  { %v3217_v51 = vld [vmem:[#allocation8 + $0x1a0] sm:$0xff]  }
 0x15f   :  { %3053 = vmatpush3.bf16.msra.mxu0 %v3184_v52  ;;  %3075 = vmatpush3.bf16.msra.mxu1 %v3185_v53  ;;  %v3218_v52 = vld [vmem:[#allocation8 + $0x168] sm:$0xff]  }
 0x160   :  { %3054 = vmatprep.subr.bf16.mxu0 %v3186_v54  ;;  %3076 = vmatprep.subr.bf16.mxu1 %v3187_v55  ;;  %v3219_v53 = vld [vmem:[#allocation8 + $0x1e8] sm:$0xff]  }
 0x161   :  { %v3220_v54 = vld [vmem:[#allocation8 + $0x128] sm:$0xff]  }
 0x162   :  { %v3221_v55 = vld [vmem:[#allocation8 + $0x1a8] sm:$0xff]  }
 0x163   :  { %3055 = vmatpush3.bf16.msra.mxu0 %v3188_v57  ;;  %3077 = vmatpush3.bf16.msra.mxu1 %v3189_v58  ;;  %v3222_v57 = vld [vmem:[#allocation8 + $0x170] sm:$0xff]  }
 0x164   :  { %3056 = vmatprep.subr.bf16.mxu0 %v3190_v21  ;;  %3078 = vmatprep.subr.bf16.mxu1 %v3191_v60  ;;  %v3223_v58 = vld [vmem:[#allocation8 + $0x1f0] sm:$0xff]  }
 0x165   :  { %v3224_v21 = vld [vmem:[#allocation8 + $0x130] sm:$0xff]  }
 0x166   :  { %v3225_v60 = vld [vmem:[#allocation8 + $0x1b0] sm:$0xff]  }
 0x167   :  { %3057 = vmatpush3.bf16.msra.mxu0 %v3192_v61  ;;  %3079 = vmatpush3.bf16.msra.mxu1 %v3193_v3  ;;  %v3226_v61 = vld [vmem:[#allocation8 + $0x178] sm:$0xff]  }
 0x168   :  { %3058 = vmatprep.subr.bf16.mxu0 %v3194_v62  ;;  %3080 = vmatprep.subr.bf16.mxu1 %v3195_v63  ;;  %v3227_v3 = vld [vmem:[#allocation8 + $0x1f8] sm:$0xff]  }
 0x169   :  { %v3228_v62 = vld [vmem:[#allocation8 + $0x138] sm:$0xff]  }
 0x16a   :  { %v3229_v63 = vld [vmem:[#allocation8 + $0x1b8] sm:$0xff]  }
 0x16b   :  { %3059 = vmatpush3.bf16.msra.mxu0 %v3196_v0  ;;  %3081 = vmatpush3.bf16.msra.mxu1 %v3197_v1  ;;  %v350_v0 = vsub.s32 4, %v3436_v46  ;;  %v358_v1 = vsub.s32 6, %v3436_v46 }
 0x16c   :  { %3088 = vmatprep.subr.bf16.mxu0 %v3198_v2  ;;  %3110 = vmatprep.subr.bf16.mxu1 %v3199_v4  ;;  %v354_v2 = vsub.s32 5, %v3436_v46  ;;  %v362_v4 = vsub.s32 7, %v3436_v46 }
 0x16d   :  { %v351_v32 = vrot.slane %v3477_v5, %v350_v0  ;;  %v359_v6 = vrot.slane %v3477_v5, %v358_v1 }
 0x16e   :  { %v355_v7 = vrot.slane %v3477_v5, %v354_v2  ;;  %v363_v8 = vrot.slane %v3477_v5, %v362_v4 }
 0x1a1   :  { %v1756_v13 = vpop.f32.mrb[0].mxu0  ;;  %v1838_v15 = vpop.f32.mrb[0].mxu1 }
 0x1a2   :  { %v3132_v14 = vadd.f32 %v1756_v13, %v335_v9  ;;  %v1758_v16 = vpop.f32.mrb[1].mxu0  ;;  %v3134_v17 = vadd.f32 %v1838_v15, %v343_v10  ;;  %v1840_v19 = vpop.f32.mrb[1].mxu1 }
 0x1a3   :  { %v3133_v18 = vadd.f32 %v1758_v16, %v339_v11  ;;  %v1760_v20 = vpop.f32.mrb[2].mxu0  ;;  %v3135_v23 = vadd.f32 %v1840_v19, %v347_v12  ;;  %v1842_v24 = vpop.f32.mrb[2].mxu1 }
 0x1a4   :  { %v2009_v22 = vmax.f32 %v3132_v14, 0.0  ;;  %v1761_v25 = vpop.f32.mrb[3].mxu0  ;;  %v2011_v26 = vmax.f32 %v3134_v17, 0.0  ;;  %v1843_v28 = vpop.f32.mrb[3].mxu1 }
 0x1a5   :  { %v2010_v27 = vmax.f32 %v3133_v18, 0.0  ;;  %v2012_v29 = vmax.f32 %v3135_v23, 0.0 }
 0x1a6   :  { %v2017_v59 = vpack.c.bf16 %v2009_v22, %v2009_v22  ;;  %v2019_v36 = vpack.c.bf16 %v2011_v26, %v2011_v26 }
 0x1a7   :  { %v2018_v30 = vpack.c.bf16 %v2010_v27, %v2010_v27  ;;  %v2020_v33 = vpack.c.bf16 %v2012_v29, %v2012_v29 }
 0x1a9   :  { %2576 = vmatprep.mubr.bf16.mxu0 %v2018_v30  ;;  %2616 = vmatprep.mubr.bf16.mxu1 %v2020_v33  ;;  %v2979_v30 = vld [vmem:[%s3513_s4] ss:$0 sm:$0xff]  ;;  %s3357_s4 = smov [#allocation10]  }
 0x1aa   :  { %2577 = vmatmul.mubr.bf16.vlgmr.msra.gmra.mrb[8].mxu0 %v2017_v59  ;;  %2617 = vmatmul.mubr.bf16.vlgmr.msra.gmra.mrb[8].mxu1 %v2019_v36  ;;  %s2711_s1 = sshll.u32 %s3357_s4, 4  ;;  %s2712_s1 = int_to_ptr.vmem [resolvable:$true] %s2711_s1 }
 0x1ab   :  { %3089 = vmatpush3.bf16.msra.mxu0 %v3200_v31  ;;  %3111 = vmatpush3.bf16.msra.mxu1 %v3201_v34  ;;  %s3318_s18 = scalar_lea.vmem %s2712_s1, 32  ;;  %p3323_p5 = scmp.lt.s32.totalorder %s2712_s1, %s2712_s1 }
 0x1ac   :  { %3090 = vmatprep.subr.bf16.mxu0 %v3202_v35  ;;  %3112 = vmatprep.subr.bf16.mxu1 %v3203_v37  ;;  %p3319_p4 = scmp.ne.s32.totalorder %s2712_s1, %s3318_s18  ;;  %p3324_p6 = scmp.lt.s32.totalorder %s3318_s18, %s3318_s18 }
 0x1ae   :  { %p3325_p7 = por %p3324_p6, %p3323_p5 }
 0x1af   :  { %3091 = vmatpush3.bf16.msra.mxu0 %v3204_v38  ;;  %3113 = vmatpush3.bf16.msra.mxu1 %v3205_v39 }
 0x1b0   :  { %3092 = vmatprep.subr.bf16.mxu0 %v3206_v40  ;;  %3114 = vmatprep.subr.bf16.mxu1 %v3207_v41  ;;  %p3326_p8 = pnand %p3325_p7, %p3319_p4 }
 0x1b3   :  { %3093 = vmatpush3.bf16.msra.mxu0 %v3208_v42  ;;  %3115 = vmatpush3.bf16.msra.mxu1 %v3209_v43 }
 0x1b4   :  { %3094 = vmatprep.subr.bf16.mxu0 %v3210_v44  ;;  %3116 = vmatprep.subr.bf16.mxu1 %v3211_v45 }
 0x1b7   :  { %3095 = vmatpush3.bf16.msra.mxu0 %v3212_v47  ;;  %3117 = vmatpush3.bf16.msra.mxu1 %v3213_v48 }
 0x1b8   :  { %3096 = vmatprep.subr.bf16.mxu0 %v3214_v49  ;;  %3118 = vmatprep.subr.bf16.mxu1 %v3215_v56 }
 0x1bb   :  { %3097 = vmatpush3.bf16.msra.mxu0 %v3216_v50  ;;  %3119 = vmatpush3.bf16.msra.mxu1 %v3217_v51 }
 0x1bc   :  { %3098 = vmatprep.subr.bf16.mxu0 %v3218_v52  ;;  %3120 = vmatprep.subr.bf16.mxu1 %v3219_v53 }
 0x1bf   :  { %3099 = vmatpush3.bf16.msra.mxu0 %v3220_v54  ;;  %3121 = vmatpush3.bf16.msra.mxu1 %v3221_v55 }
 0x1c0   :  { %3100 = vmatprep.subr.bf16.mxu0 %v3222_v57  ;;  %3122 = vmatprep.subr.bf16.mxu1 %v3223_v58 }
 0x1c3   :  { %3101 = vmatpush3.bf16.msra.mxu0 %v3224_v21  ;;  %3123 = vmatpush3.bf16.msra.mxu1 %v3225_v60 }
 0x1c4   :  { %3102 = vmatprep.subr.bf16.mxu0 %v3226_v61  ;;  %3124 = vmatprep.subr.bf16.mxu1 %v3227_v3 }
 0x1c7   :  { %3103 = vmatpush3.bf16.msra.mxu0 %v3228_v62  ;;  %3125 = vmatpush3.bf16.msra.mxu1 %v3229_v63 }
 0x221   :  { %v1920_v9 = vpop.f32.mrb[4].mxu0  ;;  %v2002_v11 = vpop.f32.mrb[4].mxu1 }
 0x222   :  { %v3136_v10 = vadd.f32 %v1920_v9, %v351_v32  ;;  %v1922_v12 = vpop.f32.mrb[5].mxu0  ;;  %v3138_v13 = vadd.f32 %v2002_v11, %v359_v6  ;;  %v2004_v15 = vpop.f32.mrb[5].mxu1 }
 0x223   :  { %v3137_v14 = vadd.f32 %v1922_v12, %v355_v7  ;;  %v1924_v16 = vpop.f32.mrb[6].mxu0  ;;  %v3139_v18 = vadd.f32 %v2004_v15, %v363_v8  ;;  %v2006_v19 = vpop.f32.mrb[6].mxu1 }
 0x224   :  { %v2013_v17 = vmax.f32 %v3136_v10, 0.0  ;;  %v1925_v46 = vpop.f32.mrb[7].mxu0  ;;  %v2015_v20 = vmax.f32 %v3138_v13, 0.0  ;;  %v2007_v23 = vpop.f32.mrb[7].mxu1 }
 0x225   :  { %v2014_v22 = vmax.f32 %v3137_v14, 0.0  ;;  %v2016_v24 = vmax.f32 %v3139_v18, 0.0 }
 0x226   :  { %v2021_v26 = vpack.c.bf16 %v2013_v17, %v2013_v17  ;;  %v2023_v5 = vpack.c.bf16 %v2015_v20, %v2015_v20 }
 0x227   :  { %v2022_v25 = vpack.c.bf16 %v2014_v22, %v2014_v22  ;;  %v2024_v27 = vpack.c.bf16 %v2016_v24, %v2016_v24 }
 0x229   :  { %2656 = vmatprep.mubr.bf16.mxu0 %v2022_v25  ;;  %2696 = vmatprep.mubr.bf16.mxu1 %v2024_v27 }
 0x22a   :  { %2657 = vmatmul.mubr.bf16.vlgmr.msra.gmra.mrb[12].mxu0 %v2021_v26  ;;  %2697 = vmatmul.mubr.bf16.vlgmr.msra.gmra.mrb[12].mxu1 %v2023_v5 }
 0x27d   :  { %v3060_v28 = vpop.f32.mrb[8].mxu0  ;;  %v3082_v29 = vpop.f32.mrb[8].mxu1 }
 0x27e   :  { %v3061_v31 = vpop.f32.mrb[9].mxu0  ;;  %v3083_v33 = vpop.f32.mrb[9].mxu1 }
 0x27f   :  { %v3062_v59 = vadd.f32 %v3061_v31, %v3060_v28  ;;  %v3063_v34 = vpop.f32.mrb[10].mxu0  ;;  %v3084_v35 = vadd.f32 %v3083_v33, %v3082_v29  ;;  %v3085_v36 = vpop.f32.mrb[10].mxu1 }
 0x280   :  { %v3064_v37 = vpop.f32.mrb[11].mxu0  ;;  %v3086_v39 = vpop.f32.mrb[11].mxu1 }
 0x281   :  { %v2579_v38 = vadd.f32 %v3062_v59, %v2979_v30 }
 0x283   :  { %v2619_v40 = vadd.f32 %v3084_v35, %v2579_v38 }
 0x2fd   :  { %v3104_v41 = vpop.f32.mrb[12].mxu0  ;;  %v3126_v42 = vpop.f32.mrb[12].mxu1 }
 0x2fe   :  { %v3105_v43 = vpop.f32.mrb[13].mxu0  ;;  %v3127_v45 = vpop.f32.mrb[13].mxu1 }
 0x2ff   :  { %v3106_v44 = vadd.f32 %v3105_v43, %v3104_v41  ;;  %v3107_v47 = vpop.f32.mrb[14].mxu0  ;;  %v3128_v48 = vadd.f32 %v3127_v45, %v3126_v42  ;;  %v3129_v49 = vpop.f32.mrb[14].mxu1 }
 0x300   :  { %v3108_v56 = vpop.f32.mrb[15].mxu0  ;;  %v3130_v51 = vpop.f32.mrb[15].mxu1 }
 0x301   :  { %v2659_v50 = vadd.f32 %v3106_v44, %v2619_v40 }
 0x303   :  { %v2699_v52 = vadd.f32 %v3128_v48, %v2659_v50 }
 0x305   :  { %2704 = vst [vmem:[#allocation10] sm:$0x3] %v2699_v52 }
 0x306   :  { %3329 = shalt.err (!%p3326_p8)
}
 0x307   :  { %s3330_s21 = scalar_lea.hbm %s3514_s5, 32 }
 0x308   :  { %p3331_p9 = scmp.ne.s32.totalorder %s3514_s5, %s3330_s21  ;;  %p3334_p10 = scmp.lt.u32.totalorder %s3330_s21, %s3514_s5 }
 0x30a   :  { %p3336_p11 = pnand %p3334_p10, %p3331_p9 }
 0x30c   :  { %3339 = shalt.err (!%p3336_p11)
}
 0x30d   :  { %2714 = dma.vmem_to_hbm [thread:$0]  %s2712_s1, 32, %s3514_s5, [#allocation4]  }
 0x30e   :  { %3346 = dma.done.wait [#allocation4], 32  }
 0x30f   :  { %3347 = vsyncadd [#allocation4], 4294967264 }
 0x310   :  { %2718 = vsyncpa [#allocation3], 1 }
 0x311   :  { %2719 = vsyncpa [#allocation6], 1 }
 0x312   :  { %2720 = vsyncpa [#allocation9], 1 }
 0x313   :  { %2721 = vsyncpa [#allocation4], 1 }

</bundles_post_ra>
